<compile_context>
chip_gen: v7x
topology: tpu7x:2x2x1
jax: 0.10.0
libtpu: 0.0.40
codegen_flags: <defaults>
</compile_context>

<pallas_src>
import functools

import jax
import jax.numpy as jnp
from jax import lax
from jax.experimental import pallas as pl
from jax.experimental.pallas import tpu as pltpu


def _pyramid_kernel(x_ref, coord_ref, chv_ref, stv_ref, mats_ref, out_ref,
                    xflat_ref, *, H, W, C, G, M, dilations):
    S = H * W
    R = G * C                                   # packed rows: G images x C channels

    x2d = x_ref[...]                            # (R, S) f32, row = g*C + c

    # Stage the flat image in the middle of a lane-padded scratch so every
    # shifted depthwise tap is an in-bounds *static* lane slice.  The pad
    # lanes are never consumed unmasked (any pad read is select'ed to zero by
    # the border masks below), so they are intentionally NOT zeroed — saves
    # 2x(R,M) vector stores per grid step (stores are the scarcest slot).
    xflat_ref[:, M:M + S] = x2d

    h_idx = coord_ref[0:1, :]                   # (1, S) int32 pixel row
    w_idx = coord_ref[1:2, :]                   # (1, S) int32 pixel col

    # --- masked-tap cache keyed on the flattened offset (dh, dw).  With
    #     dilations (1,1,4,8) branches 0 and 1 share all 9 offsets and the
    #     centre tap is shared by every branch: 25 unique slices instead of 36.
    hm, wm, taps = {}, {}, {}

    def masked_tap(dh, dw):
        key = (dh, dw)
        if key in taps:
            return taps[key]
        base = M + dh * W + dw
        tap = xflat_ref[:, base:base + S]
        if dh not in hm:
            hm[dh] = (h_idx < H - dh) if dh > 0 else ((h_idx >= -dh) if dh < 0 else None)
        if dw not in wm:
            wm[dw] = (w_idx < W - dw) if dw > 0 else ((w_idx >= -dw) if dw < 0 else None)
        mh, mw = hm[dh], wm[dw]
        m = mh if mw is None else (mw if mh is None else (mh & mw))
        if m is not None:                       # 2-D conv zero padding (select, NaN-safe)
            tap = jnp.where(m, tap, 0.0)
        taps[key] = tap
        return tap

    # --- four depthwise 3x3 branches (conv bias + BN folded) + ReLU ---------
    ys = []
    for bi, d in enumerate(dilations):
        contribs = []
        for ki in range(3):
            for kj in range(3):
                idx = bi * 9 + ki * 3 + kj
                contribs.append(masked_tap((ki - 1) * d, (kj - 1) * d)
                                * chv_ref[:, idx:idx + 1])
        while len(contribs) > 1:                # tree-reduce: 4 levels, not 9
            nxt = [contribs[i] + contribs[i + 1]
                   for i in range(0, len(contribs) - 1, 2)]
            if len(contribs) % 2:
                nxt.append(contribs[-1])
            contribs = nxt
        ys.append(jnp.maximum(contribs[0] + chv_ref[:, 36 + bi:37 + bi], 0.0))
    y_stack = jnp.concatenate(ys, axis=0)       # (4R, S), branch-major rows

    # --- batched pointwise 1x1 (+BN) + ReLU: ONE block-diagonal matmul ------
    bd_pw = mats_ref[0:4 * R, :]                # (4R, 4R)
    z = jnp.dot(bd_pw, y_stack, preferred_element_type=jnp.float32)
    z = jnp.maximum(z + stv_ref[:, 0:1], 0.0)

    # --- conv_cat: depthwise 1x1 (+BN) + ReLU, then ONE stacked (R,4R) matmul
    #     which also performs the cross-branch sum ---------------------------
    t = jnp.maximum(z * stv_ref[:, 1:2] + stv_ref[:, 2:3], 0.0)
    cat_m = mats_ref[4 * R:5 * R, :]            # (R, 4R)
    out = jnp.dot(cat_m, t, preferred_element_type=jnp.float32)   # (R, S)

    # --- global branch: spatial mean -> 1x1 conv -> BN -> ReLU.  Bilinear
    #     upsample of a 1x1 map (align_corners=True) is a constant broadcast,
    #     so its conv_cat contribution is a per-channel constant (R, 1). -----
    w5 = mats_ref[5 * R:6 * R, 0:R]
    cat5 = mats_ref[6 * R:7 * R, 0:R]
    g = jnp.mean(x2d, axis=1, keepdims=True)                      # (R, 1)
    gv = jnp.dot(w5, g, preferred_element_type=jnp.float32) + chv_ref[:, 40:41]
    gv = jnp.maximum(gv, 0.0)
    t5 = jnp.maximum(gv * chv_ref[:, 41:42] + chv_ref[:, 42:43], 0.0)
    out = out + jnp.dot(cat5, t5, preferred_element_type=jnp.float32)

    out_ref[...] = jnp.maximum(out + chv_ref[:, 43:44], 0.0).astype(out_ref.dtype)


def _fold_bn(gamma, beta, mean, var, eps=1e-5):
    scale = gamma / jnp.sqrt(var + eps)
    shift = beta - mean * scale
    return scale, shift


def init_params(key, C, rate=1):
    keys = iter(jax.random.split(key, 64))

    def nrm(shape, s=0.1):
        return s * jax.random.normal(next(keys), shape, jnp.float32)

    def bn(c):
        gamma = 1.0 + 0.1 * jax.random.normal(next(keys), (c,), jnp.float32)
        beta = 0.1 * jax.random.normal(next(keys), (c,), jnp.float32)
        mean = 0.1 * jax.random.normal(next(keys), (c,), jnp.float32)
        var = 1.0 + 0.1 * jnp.abs(jax.random.normal(next(keys), (c,), jnp.float32))
        return _fold_bn(gamma, beta, mean, var)

    dilations = (rate, 1, 4 * rate, 8 * rate)
    dw_w, dw_b, pw_w, pw_b = [], [], [], []
    for bi in range(4):
        w_dw = nrm((3, 3, C))                                   # per-channel taps
        b_dw = nrm((C,)) if bi == 0 else jnp.zeros((C,), jnp.float32)
        s1, sh1 = bn(C)
        dw_w.append(w_dw * s1)
        dw_b.append(b_dw * s1 + sh1)
        w_pw = nrm((C, C))                                      # (Cin, Cout)
        b_pw = nrm((C,)) if bi == 0 else jnp.zeros((C,), jnp.float32)
        s2, sh2 = bn(C)
        pw_w.append(w_pw * s2[None, :])
        pw_b.append(b_pw * s2 + sh2)

    params = dict(
        dw_w=jnp.stack(dw_w).reshape(4 * 9, C),                 # (36, C)
        dw_b=jnp.stack(dw_b),                                   # (4, C)
        pw_w=jnp.stack(pw_w),                                   # (4, C, C)
        pw_b=jnp.stack(pw_b),                                   # (4, C)
    )

    w5, b5 = nrm((C, C)), nrm((C,))
    s5, sh5 = bn(C)
    params['w5'] = w5 * s5[None, :]
    params['b5'] = (b5 * s5 + sh5)[None, :]                     # (1, C)

    wdc = nrm((5 * C,))                                         # depthwise 1x1
    sdc, shdc = bn(5 * C)
    params['dwcat_w'] = (wdc * sdc)[None, :]                    # (1, 5C)
    params['dwcat_b'] = shdc[None, :]                           # (1, 5C)

    wc = nrm((5 * C, C))
    sc, shc = bn(C)
    params['cat_w'] = wc * sc[None, :]                          # (5C, C)
    params['cat_b'] = shc[None, :]                              # (1, C)
    params['dilations'] = dilations
    return params


def _pick_group(B, C):
    """Smallest batch-group G dividing B with G*C a multiple of 8 sublanes;
    fall back to the whole batch (full-extent row block is always legal)."""
    for g in range(1, B + 1):
        if B % g == 0 and (g * C) % 8 == 0:
            return g
    return B


def _vmem_cap_bytes():
    try:
        return int(pltpu.get_tpu_info().vmem_capacity_bytes)
    except Exception:
        return 64 * 2 ** 20      # conservative default: v7x per-TensorCore VMEM


def pyramid_extraction(x_nchw, params, rate=1):
    B, C, H, W = x_nchw.shape
    S = H * W
    d_max = 8 * rate
    M = ((d_max * (W + 1) + 127) // 128) * 128   # halo pad, rounded to lanes
    dilations = params['dilations']

    G = _pick_group(B, C)                        # images packed per grid step
    R = G * C                                    # sublane rows per step

    # NCHW -> (B*C, S) is a free reshape in HBM; no transposes anywhere.
    x_flat = x_nchw.reshape(B * C, S).astype(jnp.float32)

    # per-pixel (row, col) coordinates for the in-kernel border masks
    hh = (jnp.arange(S, dtype=jnp.int32) // W).reshape(1, S)
    ww = (jnp.arange(S, dtype=jnp.int32) % W).reshape(1, S)
    coords = jnp.concatenate([hh, ww], axis=0)                   # (2, S)

    # channel-major (transposed) views of the folded parameters
    dw_wT = params['dw_w'].T                                     # (C, 36)
    dw_bT = params['dw_b'].T                                     # (C, 4)
    pw_wT = jnp.transpose(params['pw_w'], (0, 2, 1))             # (4, Cout, Cin)
    pw_bT = params['pw_b'].T                                     # (C, 4)
    w5T = params['w5'].T                                         # (Cout, Cin)
    b5T = params['b5'].T                                         # (C, 1)
    dwcat_wT = params['dwcat_w'].reshape(5, C).T                 # (C, 5)
    dwcat_bT = params['dwcat_b'].reshape(5, C).T                 # (C, 5)
    cat_wT = jnp.transpose(params['cat_w'].reshape(5, C, C), (0, 2, 1))  # (5,Cout,Cin)
    cat_bT = params['cat_b'].T                                   # (C, 1)

    # ---- 3 consolidated weight inputs (instead of 11) ----------------------
    # (a) per-row (channel, tiled over the batch group) vector slab, 44 cols:
    #     [0:36] dw taps, [36:40] dw bias, [40] b5, [41] dwcat_w[g], [42]
    #     dwcat_b[g], [43] cat_b.
    ch_vecs = jnp.tile(jnp.concatenate(
        [dw_wT, dw_bT, b5T, dwcat_wT[:, 4:5], dwcat_bT[:, 4:5], cat_bT],
        axis=1), (G, 1))                                         # (R, 44)

    # (b) branch-stacked per-row vectors for the fused pointwise/conv_cat stage
    def stack4(mat_c):                                           # (C, >=4) -> (4R, 1)
        return jnp.concatenate(
            [jnp.tile(mat_c[:, bi], G) for bi in range(4)]).reshape(4 * R, 1)
    stack_vecs = jnp.concatenate(
        [stack4(pw_bT), stack4(dwcat_wT), stack4(dwcat_bT)], axis=1)  # (4R, 3)

    # (c) one matrix slab: block-diag pointwise weight, stacked conv_cat weight
    #     (its matmul performs the cross-branch sum), and the two tiny global-
    #     branch matrices.  Rows: [0:4R] bd_pw, [4R:5R] cat, [5R:6R] w5,
    #     [6R:7R] cat5.
    eyeG = jnp.eye(G, dtype=jnp.float32)
    bd_pw = jnp.zeros((4 * R, 4 * R), jnp.float32)
    for bi in range(4):
        bd_pw = bd_pw.at[bi * R:(bi + 1) * R, bi * R:(bi + 1) * R].set(
            jnp.kron(eyeG, pw_wT[bi]))
    cat_m = jnp.concatenate([jnp.kron(eyeG, cat_wT[bi]) for bi in range(4)],
                            axis=1)                              # (R, 4R)
    zpad = jnp.zeros((R, 3 * R), jnp.float32)
    mats = jnp.concatenate(
        [bd_pw, cat_m,
         jnp.concatenate([jnp.kron(eyeG, w5T), zpad], axis=1),
         jnp.concatenate([jnp.kron(eyeG, cat_wT[4]), zpad], axis=1)],
        axis=0)                                                  # (7R, 4R)

    weights = [coords, ch_vecs, stack_vecs, mats]

    def full(a):  # whole (small) parameter array as one block
        return pl.BlockSpec(a.shape, lambda b, _nd=a.ndim: (0,) * _nd)

    kern = functools.partial(_pyramid_kernel, H=H, W=W, C=C, G=G, M=M,
                             dilations=dilations)

    # generation-aware explicit VMEM budget: double-buffered in/out blocks,
    # halo scratch, weights and the stacked (4R,S) intermediates + headroom.
    blk = 4 * R * S
    w_bytes = 4 * sum(int(w.size) for w in weights)
    est = 4 * blk + 4 * R * (S + 2 * M) + 2 * w_bytes + 14 * blk + (1 << 20)
    vmem_limit = int(min(int(0.75 * _vmem_cap_bytes()),
                         max(8 * 2 ** 20, 2 * est)))

    # TODO(synk): when G == B the grid collapses to 1 step and the second v7x
    # TensorCore idles; for production sizes add a parallel S-split (with a
    # d_max halo) grid axis, and consider bf16 taps on v6e/v7x once C >= 16.
    out = pl.pallas_call(
        kern,
        out_shape=jax.ShapeDtypeStruct((B * C, S), jnp.float32),
        grid=(B // G,),
        in_specs=[pl.BlockSpec((R, S), lambda b: (b, 0))]
                 + [full(w) for w in weights],
        out_specs=pl.BlockSpec((R, S), lambda b: (b, 0)),
        scratch_shapes=[pltpu.VMEM((R, S + 2 * M), jnp.float32)],
        compiler_params=pltpu.CompilerParams(
            dimension_semantics=("parallel",),   # batch-group steps independent
            vmem_limit_bytes=vmem_limit),
    )(x_flat, *weights)

    return out.reshape(B, C, H, W)                               # already NCHW


def reference(x_nchw, params, rate=1):
    """Pure-JAX reference (same folded parameters)."""
    B, C, H, W = x_nchw.shape
    x = jnp.transpose(x_nchw, (0, 2, 3, 1)).astype(jnp.float32)
    dilations = params['dilations']
    hp = lax.Precision.HIGHEST
    dw_w = params['dw_w'].reshape(4, 3, 3, C)
    outs = []
    for bi, d in enumerate(dilations):
        rhs = dw_w[bi][:, :, None, :]                            # (3,3,1,C) HWIO
        y = lax.conv_general_dilated(
            x, rhs, window_strides=(1, 1), padding=[(d, d), (d, d)],
            rhs_dilation=(d, d), dimension_numbers=('NHWC', 'HWIO', 'NHWC'),
            feature_group_count=C, precision=hp)
        y = jnp.maximum(y + params['dw_b'][bi], 0.0)
        z = jnp.einsum('bhwc,cd->bhwd', y, params['pw_w'][bi], precision=hp)
        z = jnp.maximum(z + params['pw_b'][bi], 0.0)
        outs.append(z)
    g = jnp.mean(x, axis=(1, 2), keepdims=True)
    gv = jnp.einsum('bhwc,cd->bhwd', g, params['w5'], precision=hp) + params['b5']
    gv = jnp.maximum(gv, 0.0)
    gb = jnp.broadcast_to(gv, (B, H, W, C))
    cat = jnp.concatenate(outs + [gb], axis=-1)
    t = jnp.maximum(cat * params['dwcat_w'][0] + params['dwcat_b'][0], 0.0)
    out = jnp.einsum('bhwc,cd->bhwd', t, params['cat_w'], precision=hp)
    out = jnp.maximum(out + params['cat_b'][0], 0.0)
    return jnp.transpose(out, (0, 3, 1, 2))


if __name__ == "__main__":
    key = jax.random.PRNGKey(0)
    kx, kp = jax.random.split(key)
    B, C, H, W = 2, 4, 16, 16
    rate = 1
    x = jax.random.normal(kx, (B, C, H, W), jnp.float32)
    params = init_params(kp, C, rate)

    out = pyramid_extraction(x, params, rate)
    out = jax.block_until_ready(out)

    ref = reference(x, params, rate)
    assert out.shape == (B, C, H, W)
    assert bool(jnp.all(jnp.isfinite(out)))
    assert bool(jnp.allclose(out, ref, rtol=1e-2, atol=1e-3)), \
        ("max abs diff", float(jnp.max(jnp.abs(out - ref))))
    print("KERNEL_OK")
</pallas_src>

<mosaic_0001>
module attributes {stable_mosaic.version = 11 : i64} {
  func.func @_pyramid_kernel(%arg0: i32, %arg1: memref<8x256xf32, #tpu.memory_space<vmem>>, %arg2: memref<2x256xi32, #tpu.memory_space<vmem>>, %arg3: memref<8x44xf32, #tpu.memory_space<vmem>>, %arg4: memref<32x3xf32, #tpu.memory_space<vmem>>, %arg5: memref<56x32xf32, #tpu.memory_space<vmem>>, %arg6: memref<8x256xf32, #tpu.memory_space<vmem>>, %arg7: memref<8x768xf32, #tpu.memory_space<vmem>>) attributes {dimension_semantics = [#tpu.dimension_semantics<parallel>], iteration_bounds = array<i64: 1>, scalar_prefetch = 0 : i64, scratch_operands = 1 : i64, tpu.core_type = #tpu.core_type<tc>, window_params = [{transform_indices = @transform_0, window_bounds = array<i64: 8, 256>}, {pipeline_mode = #tpu.pipeline_mode<synchronous>, transform_indices = @transform_1, window_bounds = array<i64: 2, 256>}, {pipeline_mode = #tpu.pipeline_mode<synchronous>, transform_indices = @transform_2, window_bounds = array<i64: 8, 44>}, {pipeline_mode = #tpu.pipeline_mode<synchronous>, transform_indices = @transform_3, window_bounds = array<i64: 32, 3>}, {pipeline_mode = #tpu.pipeline_mode<synchronous>, transform_indices = @transform_4, window_bounds = array<i64: 56, 32>}, {transform_indices = @transform_5, window_bounds = array<i64: 8, 256>}]} {
    %c0 = arith.constant 0 : index
    %c0_0 = arith.constant 0 : index
    %0 = vector.load %arg1[%c0, %c0_0] : memref<8x256xf32, #tpu.memory_space<vmem>>, vector<8x256xf32>
    %c0_1 = arith.constant 0 : index
    %c256 = arith.constant 256 : index
    %1 = vector.load %arg7[%c0_1, %c256] : memref<8x768xf32, #tpu.memory_space<vmem>>, vector<8x256xf32>
    tpu.vector_store %arg7[%c0_1, %c256], %0 {strides = array<i32>} : memref<8x768xf32, #tpu.memory_space<vmem>>, vector<8x256xf32>,
    %c0_2 = arith.constant 0 : index
    %c0_3 = arith.constant 0 : index
    %2 = vector.load %arg2[%c0_2, %c0_3] : memref<2x256xi32, #tpu.memory_space<vmem>>, vector<1x256xi32>
    %c1 = arith.constant 1 : index
    %c0_4 = arith.constant 0 : index
    %3 = vector.load %arg2[%c1, %c0_4] : memref<2x256xi32, #tpu.memory_space<vmem>>, vector<1x256xi32>
    %c0_5 = arith.constant 0 : index
    %c239 = arith.constant 239 : index
    %4 = vector.load %arg7[%c0_5, %c239] : memref<8x768xf32, #tpu.memory_space<vmem>>, vector<8x256xf32>
    %c1_i32 = arith.constant 1 : i32
    %5 = vector.broadcast %c1_i32 : i32 to vector<1x256xi32>
    %6 = arith.cmpi sge, %2, %5 : vector<1x256xi32>
    %c1_i32_6 = arith.constant 1 : i32
    %7 = vector.broadcast %c1_i32_6 : i32 to vector<1x256xi32>
    %8 = arith.cmpi sge, %3, %7 : vector<1x256xi32>
    %9 = arith.andi %6, %8 : vector<1x256xi1>
    %cst = arith.constant 0.000000e+00 : f32
    %10 = vector.shape_cast %9 : vector<1x256xi1> to vector<1x256xi1>
    %11 = vector.broadcast %10 : vector<1x256xi1> to vector<8x256xi1>
    %12 = vector.broadcast %cst : f32 to vector<8x256xf32>
    %13 = arith.select %11, %4, %12 : vector<8x256xi1>, vector<8x256xf32>
    %c0_7 = arith.constant 0 : index
    %c0_8 = arith.constant 0 : index
    %14 = vector.load %arg3[%c0_7, %c0_8] : memref<8x44xf32, #tpu.memory_space<vmem>>, vector<8x1xf32>
    %15 = vector.broadcast %14 : vector<8x1xf32> to vector<8x256xf32>
    %16 = arith.mulf %13, %15 : vector<8x256xf32>
    %c0_9 = arith.constant 0 : index
    %c240 = arith.constant 240 : index
    %17 = vector.load %arg7[%c0_9, %c240] : memref<8x768xf32, #tpu.memory_space<vmem>>, vector<8x256xf32>
    %cst_10 = arith.constant 0.000000e+00 : f32
    %18 = vector.shape_cast %6 : vector<1x256xi1> to vector<1x256xi1>
    %19 = vector.broadcast %18 : vector<1x256xi1> to vector<8x256xi1>
    %20 = vector.broadcast %cst_10 : f32 to vector<8x256xf32>
    %21 = arith.select %19, %17, %20 : vector<8x256xi1>, vector<8x256xf32>
    %c0_11 = arith.constant 0 : index
    %c1_12 = arith.constant 1 : index
    %22 = vector.load %arg3[%c0_11, %c1_12] : memref<8x44xf32, #tpu.memory_space<vmem>>, vector<8x1xf32>
    %23 = vector.broadcast %22 : vector<8x1xf32> to vector<8x256xf32>
    %24 = arith.mulf %21, %23 : vector<8x256xf32>
    %c0_13 = arith.constant 0 : index
    %c241 = arith.constant 241 : index
    %25 = vector.load %arg7[%c0_13, %c241] : memref<8x768xf32, #tpu.memory_space<vmem>>, vector<8x256xf32>
    %c15_i32 = arith.constant 15 : i32
    %26 = vector.broadcast %c15_i32 : i32 to vector<1x256xi32>
    %27 = arith.cmpi slt, %3, %26 : vector<1x256xi32>
    %28 = arith.andi %6, %27 : vector<1x256xi1>
    %cst_14 = arith.constant 0.000000e+00 : f32
    %29 = vector.shape_cast %28 : vector<1x256xi1> to vector<1x256xi1>
    %30 = vector.broadcast %29 : vector<1x256xi1> to vector<8x256xi1>
    %31 = vector.broadcast %cst_14 : f32 to vector<8x256xf32>
    %32 = arith.select %30, %25, %31 : vector<8x256xi1>, vector<8x256xf32>
    %c0_15 = arith.constant 0 : index
    %c2 = arith.constant 2 : index
    %33 = vector.load %arg3[%c0_15, %c2] : memref<8x44xf32, #tpu.memory_space<vmem>>, vector<8x1xf32>
    %34 = vector.broadcast %33 : vector<8x1xf32> to vector<8x256xf32>
    %35 = arith.mulf %32, %34 : vector<8x256xf32>
    %c0_16 = arith.constant 0 : index
    %c255 = arith.constant 255 : index
    %36 = vector.load %arg7[%c0_16, %c255] : memref<8x768xf32, #tpu.memory_space<vmem>>, vector<8x256xf32>
    %cst_17 = arith.constant 0.000000e+00 : f32
    %37 = vector.shape_cast %8 : vector<1x256xi1> to vector<1x256xi1>
    %38 = vector.broadcast %37 : vector<1x256xi1> to vector<8x256xi1>
    %39 = vector.broadcast %cst_17 : f32 to vector<8x256xf32>
    %40 = arith.select %38, %36, %39 : vector<8x256xi1>, vector<8x256xf32>
    %c0_18 = arith.constant 0 : index
    %c3 = arith.constant 3 : index
    %41 = vector.load %arg3[%c0_18, %c3] : memref<8x44xf32, #tpu.memory_space<vmem>>, vector<8x1xf32>
    %42 = vector.broadcast %41 : vector<8x1xf32> to vector<8x256xf32>
    %43 = arith.mulf %40, %42 : vector<8x256xf32>
    %c0_19 = arith.constant 0 : index
    %c256_20 = arith.constant 256 : index
    %44 = vector.load %arg7[%c0_19, %c256_20] : memref<8x768xf32, #tpu.memory_space<vmem>>, vector<8x256xf32>
    %c0_21 = arith.constant 0 : index
    %c4 = arith.constant 4 : index
    %45 = vector.load %arg3[%c0_21, %c4] : memref<8x44xf32, #tpu.memory_space<vmem>>, vector<8x1xf32>
    %46 = vector.broadcast %45 : vector<8x1xf32> to vector<8x256xf32>
    %47 = arith.mulf %44, %46 : vector<8x256xf32>
    %c0_22 = arith.constant 0 : index
    %c257 = arith.constant 257 : index
    %48 = vector.load %arg7[%c0_22, %c257] : memref<8x768xf32, #tpu.memory_space<vmem>>, vector<8x256xf32>
    %cst_23 = arith.constant 0.000000e+00 : f32
    %49 = vector.shape_cast %27 : vector<1x256xi1> to vector<1x256xi1>
    %50 = vector.broadcast %49 : vector<1x256xi1> to vector<8x256xi1>
    %51 = vector.broadcast %cst_23 : f32 to vector<8x256xf32>
    %52 = arith.select %50, %48, %51 : vector<8x256xi1>, vector<8x256xf32>
    %c0_24 = arith.constant 0 : index
    %c5 = arith.constant 5 : index
    %53 = vector.load %arg3[%c0_24, %c5] : memref<8x44xf32, #tpu.memory_space<vmem>>, vector<8x1xf32>
    %54 = vector.broadcast %53 : vector<8x1xf32> to vector<8x256xf32>
    %55 = arith.mulf %52, %54 : vector<8x256xf32>
    %c0_25 = arith.constant 0 : index
    %c271 = arith.constant 271 : index
    %56 = vector.load %arg7[%c0_25, %c271] : memref<8x768xf32, #tpu.memory_space<vmem>>, vector<8x256xf32>
    %c15_i32_26 = arith.constant 15 : i32
    %57 = vector.broadcast %c15_i32_26 : i32 to vector<1x256xi32>
    %58 = arith.cmpi slt, %2, %57 : vector<1x256xi32>
    %59 = arith.andi %58, %8 : vector<1x256xi1>
    %cst_27 = arith.constant 0.000000e+00 : f32
    %60 = vector.shape_cast %59 : vector<1x256xi1> to vector<1x256xi1>
    %61 = vector.broadcast %60 : vector<1x256xi1> to vector<8x256xi1>
    %62 = vector.broadcast %cst_27 : f32 to vector<8x256xf32>
    %63 = arith.select %61, %56, %62 : vector<8x256xi1>, vector<8x256xf32>
    %c0_28 = arith.constant 0 : index
    %c6 = arith.constant 6 : index
    %64 = vector.load %arg3[%c0_28, %c6] : memref<8x44xf32, #tpu.memory_space<vmem>>, vector<8x1xf32>
    %65 = vector.broadcast %64 : vector<8x1xf32> to vector<8x256xf32>
    %66 = arith.mulf %63, %65 : vector<8x256xf32>
    %c0_29 = arith.constant 0 : index
    %c272 = arith.constant 272 : index
    %67 = vector.load %arg7[%c0_29, %c272] : memref<8x768xf32, #tpu.memory_space<vmem>>, vector<8x256xf32>
    %cst_30 = arith.constant 0.000000e+00 : f32
    %68 = vector.shape_cast %58 : vector<1x256xi1> to vector<1x256xi1>
    %69 = vector.broadcast %68 : vector<1x256xi1> to vector<8x256xi1>
    %70 = vector.broadcast %cst_30 : f32 to vector<8x256xf32>
    %71 = arith.select %69, %67, %70 : vector<8x256xi1>, vector<8x256xf32>
    %c0_31 = arith.constant 0 : index
    %c7 = arith.constant 7 : index
    %72 = vector.load %arg3[%c0_31, %c7] : memref<8x44xf32, #tpu.memory_space<vmem>>, vector<8x1xf32>
    %73 = vector.broadcast %72 : vector<8x1xf32> to vector<8x256xf32>
    %74 = arith.mulf %71, %73 : vector<8x256xf32>
    %c0_32 = arith.constant 0 : index
    %c273 = arith.constant 273 : index
    %75 = vector.load %arg7[%c0_32, %c273] : memref<8x768xf32, #tpu.memory_space<vmem>>, vector<8x256xf32>
    %76 = arith.andi %58, %27 : vector<1x256xi1>
    %cst_33 = arith.constant 0.000000e+00 : f32
    %77 = vector.shape_cast %76 : vector<1x256xi1> to vector<1x256xi1>
    %78 = vector.broadcast %77 : vector<1x256xi1> to vector<8x256xi1>
    %79 = vector.broadcast %cst_33 : f32 to vector<8x256xf32>
    %80 = arith.select %78, %75, %79 : vector<8x256xi1>, vector<8x256xf32>
    %c0_34 = arith.constant 0 : index
    %c8 = arith.constant 8 : index
    %81 = vector.load %arg3[%c0_34, %c8] : memref<8x44xf32, #tpu.memory_space<vmem>>, vector<8x1xf32>
    %82 = vector.broadcast %81 : vector<8x1xf32> to vector<8x256xf32>
    %83 = arith.mulf %80, %82 : vector<8x256xf32>
    %84 = arith.addf %16, %24 : vector<8x256xf32>
    %85 = arith.addf %35, %43 : vector<8x256xf32>
    %86 = arith.addf %47, %55 : vector<8x256xf32>
    %87 = arith.addf %66, %74 : vector<8x256xf32>
    %88 = arith.addf %84, %85 : vector<8x256xf32>
    %89 = arith.addf %86, %87 : vector<8x256xf32>
    %90 = arith.addf %88, %89 : vector<8x256xf32>
    %91 = arith.addf %90, %83 : vector<8x256xf32>
    %c0_35 = arith.constant 0 : index
    %c36 = arith.constant 36 : index
    %92 = vector.load %arg3[%c0_35, %c36] : memref<8x44xf32, #tpu.memory_space<vmem>>, vector<8x1xf32>
    %93 = vector.broadcast %92 : vector<8x1xf32> to vector<8x256xf32>
    %94 = arith.addf %91, %93 : vector<8x256xf32>
    %cst_36 = arith.constant 0.000000e+00 : f32
    %95 = vector.broadcast %cst_36 : f32 to vector<8x256xf32>
    %96 = arith.maximumf %94, %95 : vector<8x256xf32>
    %c0_37 = arith.constant 0 : index
    %c9 = arith.constant 9 : index
    %97 = vector.load %arg3[%c0_37, %c9] : memref<8x44xf32, #tpu.memory_space<vmem>>, vector<8x1xf32>
    %98 = vector.broadcast %97 : vector<8x1xf32> to vector<8x256xf32>
    %99 = arith.mulf %13, %98 : vector<8x256xf32>
    %c0_38 = arith.constant 0 : index
    %c10 = arith.constant 10 : index
    %100 = vector.load %arg3[%c0_38, %c10] : memref<8x44xf32, #tpu.memory_space<vmem>>, vector<8x1xf32>
    %101 = vector.broadcast %100 : vector<8x1xf32> to vector<8x256xf32>
    %102 = arith.mulf %21, %101 : vector<8x256xf32>
    %c0_39 = arith.constant 0 : index
    %c11 = arith.constant 11 : index
    %103 = vector.load %arg3[%c0_39, %c11] : memref<8x44xf32, #tpu.memory_space<vmem>>, vector<8x1xf32>
    %104 = vector.broadcast %103 : vector<8x1xf32> to vector<8x256xf32>
    %105 = arith.mulf %32, %104 : vector<8x256xf32>
    %c0_40 = arith.constant 0 : index
    %c12 = arith.constant 12 : index
    %106 = vector.load %arg3[%c0_40, %c12] : memref<8x44xf32, #tpu.memory_space<vmem>>, vector<8x1xf32>
    %107 = vector.broadcast %106 : vector<8x1xf32> to vector<8x256xf32>
    %108 = arith.mulf %40, %107 : vector<8x256xf32>
    %c0_41 = arith.constant 0 : index
    %c13 = arith.constant 13 : index
    %109 = vector.load %arg3[%c0_41, %c13] : memref<8x44xf32, #tpu.memory_space<vmem>>, vector<8x1xf32>
    %110 = vector.broadcast %109 : vector<8x1xf32> to vector<8x256xf32>
    %111 = arith.mulf %44, %110 : vector<8x256xf32>
    %c0_42 = arith.constant 0 : index
    %c14 = arith.constant 14 : index
    %112 = vector.load %arg3[%c0_42, %c14] : memref<8x44xf32, #tpu.memory_space<vmem>>, vector<8x1xf32>
    %113 = vector.broadcast %112 : vector<8x1xf32> to vector<8x256xf32>
    %114 = arith.mulf %52, %113 : vector<8x256xf32>
    %c0_43 = arith.constant 0 : index
    %c15 = arith.constant 15 : index
    %115 = vector.load %arg3[%c0_43, %c15] : memref<8x44xf32, #tpu.memory_space<vmem>>, vector<8x1xf32>
    %116 = vector.broadcast %115 : vector<8x1xf32> to vector<8x256xf32>
    %117 = arith.mulf %63, %116 : vector<8x256xf32>
    %c0_44 = arith.constant 0 : index
    %c16 = arith.constant 16 : index
    %118 = vector.load %arg3[%c0_44, %c16] : memref<8x44xf32, #tpu.memory_space<vmem>>, vector<8x1xf32>
    %119 = vector.broadcast %118 : vector<8x1xf32> to vector<8x256xf32>
    %120 = arith.mulf %71, %119 : vector<8x256xf32>
    %c0_45 = arith.constant 0 : index
    %c17 = arith.constant 17 : index
    %121 = vector.load %arg3[%c0_45, %c17] : memref<8x44xf32, #tpu.memory_space<vmem>>, vector<8x1xf32>
    %122 = vector.broadcast %121 : vector<8x1xf32> to vector<8x256xf32>
    %123 = arith.mulf %80, %122 : vector<8x256xf32>
    %124 = arith.addf %99, %102 : vector<8x256xf32>
    %125 = arith.addf %105, %108 : vector<8x256xf32>
    %126 = arith.addf %111, %114 : vector<8x256xf32>
    %127 = arith.addf %117, %120 : vector<8x256xf32>
    %128 = arith.addf %124, %125 : vector<8x256xf32>
    %129 = arith.addf %126, %127 : vector<8x256xf32>
    %130 = arith.addf %128, %129 : vector<8x256xf32>
    %131 = arith.addf %130, %123 : vector<8x256xf32>
    %c0_46 = arith.constant 0 : index
    %c37 = arith.constant 37 : index
    %132 = vector.load %arg3[%c0_46, %c37] : memref<8x44xf32, #tpu.memory_space<vmem>>, vector<8x1xf32>
    %133 = vector.broadcast %132 : vector<8x1xf32> to vector<8x256xf32>
    %134 = arith.addf %131, %133 : vector<8x256xf32>
    %cst_47 = arith.constant 0.000000e+00 : f32
    %135 = vector.broadcast %cst_47 : f32 to vector<8x256xf32>
    %136 = arith.maximumf %134, %135 : vector<8x256xf32>
    %c0_48 = arith.constant 0 : index
    %c188 = arith.constant 188 : index
    %137 = vector.load %arg7[%c0_48, %c188] : memref<8x768xf32, #tpu.memory_space<vmem>>, vector<8x256xf32>
    %c4_i32 = arith.constant 4 : i32
    %138 = vector.broadcast %c4_i32 : i32 to vector<1x256xi32>
    %139 = arith.cmpi sge, %2, %138 : vector<1x256xi32>
    %c4_i32_49 = arith.constant 4 : i32
    %140 = vector.broadcast %c4_i32_49 : i32 to vector<1x256xi32>
    %141 = arith.cmpi sge, %3, %140 : vector<1x256xi32>
    %142 = arith.andi %139, %141 : vector<1x256xi1>
    %cst_50 = arith.constant 0.000000e+00 : f32
    %143 = vector.shape_cast %142 : vector<1x256xi1> to vector<1x256xi1>
    %144 = vector.broadcast %143 : vector<1x256xi1> to vector<8x256xi1>
    %145 = vector.broadcast %cst_50 : f32 to vector<8x256xf32>
    %146 = arith.select %144, %137, %145 : vector<8x256xi1>, vector<8x256xf32>
    %c0_51 = arith.constant 0 : index
    %c18 = arith.constant 18 : index
    %147 = vector.load %arg3[%c0_51, %c18] : memref<8x44xf32, #tpu.memory_space<vmem>>, vector<8x1xf32>
    %148 = vector.broadcast %147 : vector<8x1xf32> to vector<8x256xf32>
    %149 = arith.mulf %146, %148 : vector<8x256xf32>
    %c0_52 = arith.constant 0 : index
    %c192 = arith.constant 192 : index
    %150 = vector.load %arg7[%c0_52, %c192] : memref<8x768xf32, #tpu.memory_space<vmem>>, vector<8x256xf32>
    %cst_53 = arith.constant 0.000000e+00 : f32
    %151 = vector.shape_cast %139 : vector<1x256xi1> to vector<1x256xi1>
    %152 = vector.broadcast %151 : vector<1x256xi1> to vector<8x256xi1>
    %153 = vector.broadcast %cst_53 : f32 to vector<8x256xf32>
    %154 = arith.select %152, %150, %153 : vector<8x256xi1>, vector<8x256xf32>
    %c0_54 = arith.constant 0 : index
    %c19 = arith.constant 19 : index
    %155 = vector.load %arg3[%c0_54, %c19] : memref<8x44xf32, #tpu.memory_space<vmem>>, vector<8x1xf32>
    %156 = vector.broadcast %155 : vector<8x1xf32> to vector<8x256xf32>
    %157 = arith.mulf %154, %156 : vector<8x256xf32>
    %c0_55 = arith.constant 0 : index
    %c196 = arith.constant 196 : index
    %158 = vector.load %arg7[%c0_55, %c196] : memref<8x768xf32, #tpu.memory_space<vmem>>, vector<8x256xf32>
    %c12_i32 = arith.constant 12 : i32
    %159 = vector.broadcast %c12_i32 : i32 to vector<1x256xi32>
    %160 = arith.cmpi slt, %3, %159 : vector<1x256xi32>
    %161 = arith.andi %139, %160 : vector<1x256xi1>
    %cst_56 = arith.constant 0.000000e+00 : f32
    %162 = vector.shape_cast %161 : vector<1x256xi1> to vector<1x256xi1>
    %163 = vector.broadcast %162 : vector<1x256xi1> to vector<8x256xi1>
    %164 = vector.broadcast %cst_56 : f32 to vector<8x256xf32>
    %165 = arith.select %163, %158, %164 : vector<8x256xi1>, vector<8x256xf32>
    %c0_57 = arith.constant 0 : index
    %c20 = arith.constant 20 : index
    %166 = vector.load %arg3[%c0_57, %c20] : memref<8x44xf32, #tpu.memory_space<vmem>>, vector<8x1xf32>
    %167 = vector.broadcast %166 : vector<8x1xf32> to vector<8x256xf32>
    %168 = arith.mulf %165, %167 : vector<8x256xf32>
    %c0_58 = arith.constant 0 : index
    %c252 = arith.constant 252 : index
    %169 = vector.load %arg7[%c0_58, %c252] : memref<8x768xf32, #tpu.memory_space<vmem>>, vector<8x256xf32>
    %cst_59 = arith.constant 0.000000e+00 : f32
    %170 = vector.shape_cast %141 : vector<1x256xi1> to vector<1x256xi1>
    %171 = vector.broadcast %170 : vector<1x256xi1> to vector<8x256xi1>
    %172 = vector.broadcast %cst_59 : f32 to vector<8x256xf32>
    %173 = arith.select %171, %169, %172 : vector<8x256xi1>, vector<8x256xf32>
    %c0_60 = arith.constant 0 : index
    %c21 = arith.constant 21 : index
    %174 = vector.load %arg3[%c0_60, %c21] : memref<8x44xf32, #tpu.memory_space<vmem>>, vector<8x1xf32>
    %175 = vector.broadcast %174 : vector<8x1xf32> to vector<8x256xf32>
    %176 = arith.mulf %173, %175 : vector<8x256xf32>
    %c0_61 = arith.constant 0 : index
    %c22 = arith.constant 22 : index
    %177 = vector.load %arg3[%c0_61, %c22] : memref<8x44xf32, #tpu.memory_space<vmem>>, vector<8x1xf32>
    %178 = vector.broadcast %177 : vector<8x1xf32> to vector<8x256xf32>
    %179 = arith.mulf %44, %178 : vector<8x256xf32>
    %c0_62 = arith.constant 0 : index
    %c260 = arith.constant 260 : index
    %180 = vector.load %arg7[%c0_62, %c260] : memref<8x768xf32, #tpu.memory_space<vmem>>, vector<8x256xf32>
    %cst_63 = arith.constant 0.000000e+00 : f32
    %181 = vector.shape_cast %160 : vector<1x256xi1> to vector<1x256xi1>
    %182 = vector.broadcast %181 : vector<1x256xi1> to vector<8x256xi1>
    %183 = vector.broadcast %cst_63 : f32 to vector<8x256xf32>
    %184 = arith.select %182, %180, %183 : vector<8x256xi1>, vector<8x256xf32>
    %c0_64 = arith.constant 0 : index
    %c23 = arith.constant 23 : index
    %185 = vector.load %arg3[%c0_64, %c23] : memref<8x44xf32, #tpu.memory_space<vmem>>, vector<8x1xf32>
    %186 = vector.broadcast %185 : vector<8x1xf32> to vector<8x256xf32>
    %187 = arith.mulf %184, %186 : vector<8x256xf32>
    %c0_65 = arith.constant 0 : index
    %c316 = arith.constant 316 : index
    %188 = vector.load %arg7[%c0_65, %c316] : memref<8x768xf32, #tpu.memory_space<vmem>>, vector<8x256xf32>
    %c12_i32_66 = arith.constant 12 : i32
    %189 = vector.broadcast %c12_i32_66 : i32 to vector<1x256xi32>
    %190 = arith.cmpi slt, %2, %189 : vector<1x256xi32>
    %191 = arith.andi %190, %141 : vector<1x256xi1>
    %cst_67 = arith.constant 0.000000e+00 : f32
    %192 = vector.shape_cast %191 : vector<1x256xi1> to vector<1x256xi1>
    %193 = vector.broadcast %192 : vector<1x256xi1> to vector<8x256xi1>
    %194 = vector.broadcast %cst_67 : f32 to vector<8x256xf32>
    %195 = arith.select %193, %188, %194 : vector<8x256xi1>, vector<8x256xf32>
    %c0_68 = arith.constant 0 : index
    %c24 = arith.constant 24 : index
    %196 = vector.load %arg3[%c0_68, %c24] : memref<8x44xf32, #tpu.memory_space<vmem>>, vector<8x1xf32>
    %197 = vector.broadcast %196 : vector<8x1xf32> to vector<8x256xf32>
    %198 = arith.mulf %195, %197 : vector<8x256xf32>
    %c0_69 = arith.constant 0 : index
    %c320 = arith.constant 320 : index
    %199 = vector.load %arg7[%c0_69, %c320] : memref<8x768xf32, #tpu.memory_space<vmem>>, vector<8x256xf32>
    %cst_70 = arith.constant 0.000000e+00 : f32
    %200 = vector.shape_cast %190 : vector<1x256xi1> to vector<1x256xi1>
    %201 = vector.broadcast %200 : vector<1x256xi1> to vector<8x256xi1>
    %202 = vector.broadcast %cst_70 : f32 to vector<8x256xf32>
    %203 = arith.select %201, %199, %202 : vector<8x256xi1>, vector<8x256xf32>
    %c0_71 = arith.constant 0 : index
    %c25 = arith.constant 25 : index
    %204 = vector.load %arg3[%c0_71, %c25] : memref<8x44xf32, #tpu.memory_space<vmem>>, vector<8x1xf32>
    %205 = vector.broadcast %204 : vector<8x1xf32> to vector<8x256xf32>
    %206 = arith.mulf %203, %205 : vector<8x256xf32>
    %c0_72 = arith.constant 0 : index
    %c324 = arith.constant 324 : index
    %207 = vector.load %arg7[%c0_72, %c324] : memref<8x768xf32, #tpu.memory_space<vmem>>, vector<8x256xf32>
    %208 = arith.andi %190, %160 : vector<1x256xi1>
    %cst_73 = arith.constant 0.000000e+00 : f32
    %209 = vector.shape_cast %208 : vector<1x256xi1> to vector<1x256xi1>
    %210 = vector.broadcast %209 : vector<1x256xi1> to vector<8x256xi1>
    %211 = vector.broadcast %cst_73 : f32 to vector<8x256xf32>
    %212 = arith.select %210, %207, %211 : vector<8x256xi1>, vector<8x256xf32>
    %c0_74 = arith.constant 0 : index
    %c26 = arith.constant 26 : index
    %213 = vector.load %arg3[%c0_74, %c26] : memref<8x44xf32, #tpu.memory_space<vmem>>, vector<8x1xf32>
    %214 = vector.broadcast %213 : vector<8x1xf32> to vector<8x256xf32>
    %215 = arith.mulf %212, %214 : vector<8x256xf32>
    %216 = arith.addf %149, %157 : vector<8x256xf32>
    %217 = arith.addf %168, %176 : vector<8x256xf32>
    %218 = arith.addf %179, %187 : vector<8x256xf32>
    %219 = arith.addf %198, %206 : vector<8x256xf32>
    %220 = arith.addf %216, %217 : vector<8x256xf32>
    %221 = arith.addf %218, %219 : vector<8x256xf32>
    %222 = arith.addf %220, %221 : vector<8x256xf32>
    %223 = arith.addf %222, %215 : vector<8x256xf32>
    %c0_75 = arith.constant 0 : index
    %c38 = arith.constant 38 : index
    %224 = vector.load %arg3[%c0_75, %c38] : memref<8x44xf32, #tpu.memory_space<vmem>>, vector<8x1xf32>
    %225 = vector.broadcast %224 : vector<8x1xf32> to vector<8x256xf32>
    %226 = arith.addf %223, %225 : vector<8x256xf32>
    %cst_76 = arith.constant 0.000000e+00 : f32
    %227 = vector.broadcast %cst_76 : f32 to vector<8x256xf32>
    %228 = arith.maximumf %226, %227 : vector<8x256xf32>
    %c0_77 = arith.constant 0 : index
    %c120 = arith.constant 120 : index
    %229 = vector.load %arg7[%c0_77, %c120] : memref<8x768xf32, #tpu.memory_space<vmem>>, vector<8x256xf32>
    %c8_i32 = arith.constant 8 : i32
    %230 = vector.broadcast %c8_i32 : i32 to vector<1x256xi32>
    %231 = arith.cmpi sge, %2, %230 : vector<1x256xi32>
    %c8_i32_78 = arith.constant 8 : i32
    %232 = vector.broadcast %c8_i32_78 : i32 to vector<1x256xi32>
    %233 = arith.cmpi sge, %3, %232 : vector<1x256xi32>
    %234 = arith.andi %231, %233 : vector<1x256xi1>
    %cst_79 = arith.constant 0.000000e+00 : f32
    %235 = vector.shape_cast %234 : vector<1x256xi1> to vector<1x256xi1>
    %236 = vector.broadcast %235 : vector<1x256xi1> to vector<8x256xi1>
    %237 = vector.broadcast %cst_79 : f32 to vector<8x256xf32>
    %238 = arith.select %236, %229, %237 : vector<8x256xi1>, vector<8x256xf32>
    %c0_80 = arith.constant 0 : index
    %c27 = arith.constant 27 : index
    %239 = vector.load %arg3[%c0_80, %c27] : memref<8x44xf32, #tpu.memory_space<vmem>>, vector<8x1xf32>
    %240 = vector.broadcast %239 : vector<8x1xf32> to vector<8x256xf32>
    %241 = arith.mulf %238, %240 : vector<8x256xf32>
    %c0_81 = arith.constant 0 : index
    %c128 = arith.constant 128 : index
    %242 = vector.load %arg7[%c0_81, %c128] : memref<8x768xf32, #tpu.memory_space<vmem>>, vector<8x256xf32>
    %cst_82 = arith.constant 0.000000e+00 : f32
    %243 = vector.shape_cast %231 : vector<1x256xi1> to vector<1x256xi1>
    %244 = vector.broadcast %243 : vector<1x256xi1> to vector<8x256xi1>
    %245 = vector.broadcast %cst_82 : f32 to vector<8x256xf32>
    %246 = arith.select %244, %242, %245 : vector<8x256xi1>, vector<8x256xf32>
    %c0_83 = arith.constant 0 : index
    %c28 = arith.constant 28 : index
    %247 = vector.load %arg3[%c0_83, %c28] : memref<8x44xf32, #tpu.memory_space<vmem>>, vector<8x1xf32>
    %248 = vector.broadcast %247 : vector<8x1xf32> to vector<8x256xf32>
    %249 = arith.mulf %246, %248 : vector<8x256xf32>
    %c0_84 = arith.constant 0 : index
    %c136 = arith.constant 136 : index
    %250 = vector.load %arg7[%c0_84, %c136] : memref<8x768xf32, #tpu.memory_space<vmem>>, vector<8x256xf32>
    %c8_i32_85 = arith.constant 8 : i32
    %251 = vector.broadcast %c8_i32_85 : i32 to vector<1x256xi32>
    %252 = arith.cmpi slt, %3, %251 : vector<1x256xi32>
    %253 = arith.andi %231, %252 : vector<1x256xi1>
    %cst_86 = arith.constant 0.000000e+00 : f32
    %254 = vector.shape_cast %253 : vector<1x256xi1> to vector<1x256xi1>
    %255 = vector.broadcast %254 : vector<1x256xi1> to vector<8x256xi1>
    %256 = vector.broadcast %cst_86 : f32 to vector<8x256xf32>
    %257 = arith.select %255, %250, %256 : vector<8x256xi1>, vector<8x256xf32>
    %c0_87 = arith.constant 0 : index
    %c29 = arith.constant 29 : index
    %258 = vector.load %arg3[%c0_87, %c29] : memref<8x44xf32, #tpu.memory_space<vmem>>, vector<8x1xf32>
    %259 = vector.broadcast %258 : vector<8x1xf32> to vector<8x256xf32>
    %260 = arith.mulf %257, %259 : vector<8x256xf32>
    %c0_88 = arith.constant 0 : index
    %c248 = arith.constant 248 : index
    %261 = vector.load %arg7[%c0_88, %c248] : memref<8x768xf32, #tpu.memory_space<vmem>>, vector<8x256xf32>
    %cst_89 = arith.constant 0.000000e+00 : f32
    %262 = vector.shape_cast %233 : vector<1x256xi1> to vector<1x256xi1>
    %263 = vector.broadcast %262 : vector<1x256xi1> to vector<8x256xi1>
    %264 = vector.broadcast %cst_89 : f32 to vector<8x256xf32>
    %265 = arith.select %263, %261, %264 : vector<8x256xi1>, vector<8x256xf32>
    %c0_90 = arith.constant 0 : index
    %c30 = arith.constant 30 : index
    %266 = vector.load %arg3[%c0_90, %c30] : memref<8x44xf32, #tpu.memory_space<vmem>>, vector<8x1xf32>
    %267 = vector.broadcast %266 : vector<8x1xf32> to vector<8x256xf32>
    %268 = arith.mulf %265, %267 : vector<8x256xf32>
    %c0_91 = arith.constant 0 : index
    %c31 = arith.constant 31 : index
    %269 = vector.load %arg3[%c0_91, %c31] : memref<8x44xf32, #tpu.memory_space<vmem>>, vector<8x1xf32>
    %270 = vector.broadcast %269 : vector<8x1xf32> to vector<8x256xf32>
    %271 = arith.mulf %44, %270 : vector<8x256xf32>
    %c0_92 = arith.constant 0 : index
    %c264 = arith.constant 264 : index
    %272 = vector.load %arg7[%c0_92, %c264] : memref<8x768xf32, #tpu.memory_space<vmem>>, vector<8x256xf32>
    %cst_93 = arith.constant 0.000000e+00 : f32
    %273 = vector.shape_cast %252 : vector<1x256xi1> to vector<1x256xi1>
    %274 = vector.broadcast %273 : vector<1x256xi1> to vector<8x256xi1>
    %275 = vector.broadcast %cst_93 : f32 to vector<8x256xf32>
    %276 = arith.select %274, %272, %275 : vector<8x256xi1>, vector<8x256xf32>
    %c0_94 = arith.constant 0 : index
    %c32 = arith.constant 32 : index
    %277 = vector.load %arg3[%c0_94, %c32] : memref<8x44xf32, #tpu.memory_space<vmem>>, vector<8x1xf32>
    %278 = vector.broadcast %277 : vector<8x1xf32> to vector<8x256xf32>
    %279 = arith.mulf %276, %278 : vector<8x256xf32>
    %c0_95 = arith.constant 0 : index
    %c376 = arith.constant 376 : index
    %280 = vector.load %arg7[%c0_95, %c376] : memref<8x768xf32, #tpu.memory_space<vmem>>, vector<8x256xf32>
    %c8_i32_96 = arith.constant 8 : i32
    %281 = vector.broadcast %c8_i32_96 : i32 to vector<1x256xi32>
    %282 = arith.cmpi slt, %2, %281 : vector<1x256xi32>
    %283 = arith.andi %282, %233 : vector<1x256xi1>
    %cst_97 = arith.constant 0.000000e+00 : f32
    %284 = vector.shape_cast %283 : vector<1x256xi1> to vector<1x256xi1>
    %285 = vector.broadcast %284 : vector<1x256xi1> to vector<8x256xi1>
    %286 = vector.broadcast %cst_97 : f32 to vector<8x256xf32>
    %287 = arith.select %285, %280, %286 : vector<8x256xi1>, vector<8x256xf32>
    %c0_98 = arith.constant 0 : index
    %c33 = arith.constant 33 : index
    %288 = vector.load %arg3[%c0_98, %c33] : memref<8x44xf32, #tpu.memory_space<vmem>>, vector<8x1xf32>
    %289 = vector.broadcast %288 : vector<8x1xf32> to vector<8x256xf32>
    %290 = arith.mulf %287, %289 : vector<8x256xf32>
    %c0_99 = arith.constant 0 : index
    %c384 = arith.constant 384 : index
    %291 = vector.load %arg7[%c0_99, %c384] : memref<8x768xf32, #tpu.memory_space<vmem>>, vector<8x256xf32>
    %cst_100 = arith.constant 0.000000e+00 : f32
    %292 = vector.shape_cast %282 : vector<1x256xi1> to vector<1x256xi1>
    %293 = vector.broadcast %292 : vector<1x256xi1> to vector<8x256xi1>
    %294 = vector.broadcast %cst_100 : f32 to vector<8x256xf32>
    %295 = arith.select %293, %291, %294 : vector<8x256xi1>, vector<8x256xf32>
    %c0_101 = arith.constant 0 : index
    %c34 = arith.constant 34 : index
    %296 = vector.load %arg3[%c0_101, %c34] : memref<8x44xf32, #tpu.memory_space<vmem>>, vector<8x1xf32>
    %297 = vector.broadcast %296 : vector<8x1xf32> to vector<8x256xf32>
    %298 = arith.mulf %295, %297 : vector<8x256xf32>
    %c0_102 = arith.constant 0 : index
    %c392 = arith.constant 392 : index
    %299 = vector.load %arg7[%c0_102, %c392] : memref<8x768xf32, #tpu.memory_space<vmem>>, vector<8x256xf32>
    %300 = arith.andi %282, %252 : vector<1x256xi1>
    %cst_103 = arith.constant 0.000000e+00 : f32
    %301 = vector.shape_cast %300 : vector<1x256xi1> to vector<1x256xi1>
    %302 = vector.broadcast %301 : vector<1x256xi1> to vector<8x256xi1>
    %303 = vector.broadcast %cst_103 : f32 to vector<8x256xf32>
    %304 = arith.select %302, %299, %303 : vector<8x256xi1>, vector<8x256xf32>
    %c0_104 = arith.constant 0 : index
    %c35 = arith.constant 35 : index
    %305 = vector.load %arg3[%c0_104, %c35] : memref<8x44xf32, #tpu.memory_space<vmem>>, vector<8x1xf32>
    %306 = vector.broadcast %305 : vector<8x1xf32> to vector<8x256xf32>
    %307 = arith.mulf %304, %306 : vector<8x256xf32>
    %308 = arith.addf %241, %249 : vector<8x256xf32>
    %309 = arith.addf %260, %268 : vector<8x256xf32>
    %310 = arith.addf %271, %279 : vector<8x256xf32>
    %311 = arith.addf %290, %298 : vector<8x256xf32>
    %312 = arith.addf %308, %309 : vector<8x256xf32>
    %313 = arith.addf %310, %311 : vector<8x256xf32>
    %314 = arith.addf %312, %313 : vector<8x256xf32>
    %315 = arith.addf %314, %307 : vector<8x256xf32>
    %c0_105 = arith.constant 0 : index
    %c39 = arith.constant 39 : index
    %316 = vector.load %arg3[%c0_105, %c39] : memref<8x44xf32, #tpu.memory_space<vmem>>, vector<8x1xf32>
    %317 = vector.broadcast %316 : vector<8x1xf32> to vector<8x256xf32>
    %318 = arith.addf %315, %317 : vector<8x256xf32>
    %cst_106 = arith.constant 0.000000e+00 : f32
    %319 = vector.broadcast %cst_106 : f32 to vector<8x256xf32>
    %320 = arith.maximumf %318, %319 : vector<8x256xf32>
    %321 = tpu.concatenate %96, %136, %228, %320 in 0 : vector<8x256xf32>, vector<8x256xf32>, vector<8x256xf32>, vector<8x256xf32> -> vector<32x256xf32>
    %c0_107 = arith.constant 0 : index
    %c0_108 = arith.constant 0 : index
    %322 = vector.load %arg5[%c0_107, %c0_108] : memref<56x32xf32, #tpu.memory_space<vmem>>, vector<32x32xf32>
    %cst_109 = arith.constant dense<0.000000e+00> : vector<32x256xf32>
    %323 = tpu.matmul %322, %321, %cst_109 {dimension_numbers = #tpu.dot_dimension_numbers<[1], [0], [0], [1], [0, 0, 1, 1], [], []>} : vector<32x32xf32>, vector<32x256xf32>, vector<32x256xf32> -> vector<32x256xf32>
    %c0_110 = arith.constant 0 : index
    %c0_111 = arith.constant 0 : index
    %324 = vector.load %arg4[%c0_110, %c0_111] : memref<32x3xf32, #tpu.memory_space<vmem>>, vector<32x1xf32>
    %325 = vector.broadcast %324 : vector<32x1xf32> to vector<32x256xf32>
    %326 = arith.addf %323, %325 : vector<32x256xf32>
    %cst_112 = arith.constant 0.000000e+00 : f32
    %327 = vector.broadcast %cst_112 : f32 to vector<32x256xf32>
    %328 = arith.maximumf %326, %327 : vector<32x256xf32>
    %c0_113 = arith.constant 0 : index
    %c1_114 = arith.constant 1 : index
    %329 = vector.load %arg4[%c0_113, %c1_114] : memref<32x3xf32, #tpu.memory_space<vmem>>, vector<32x1xf32>
    %330 = vector.broadcast %329 : vector<32x1xf32> to vector<32x256xf32>
    %331 = arith.mulf %328, %330 : vector<32x256xf32>
    %c0_115 = arith.constant 0 : index
    %c2_116 = arith.constant 2 : index
    %332 = vector.load %arg4[%c0_115, %c2_116] : memref<32x3xf32, #tpu.memory_space<vmem>>, vector<32x1xf32>
    %333 = vector.broadcast %332 : vector<32x1xf32> to vector<32x256xf32>
    %334 = arith.addf %331, %333 : vector<32x256xf32>
    %cst_117 = arith.constant 0.000000e+00 : f32
    %335 = vector.broadcast %cst_117 : f32 to vector<32x256xf32>
    %336 = arith.maximumf %334, %335 : vector<32x256xf32>
    %c32_118 = arith.constant 32 : index
    %c0_119 = arith.constant 0 : index
    %337 = vector.load %arg5[%c32_118, %c0_119] : memref<56x32xf32, #tpu.memory_space<vmem>>, vector<8x32xf32>
    %cst_120 = arith.constant dense<0.000000e+00> : vector<8x256xf32>
    %338 = tpu.matmul %337, %336, %cst_120 {dimension_numbers = #tpu.dot_dimension_numbers<[1], [0], [0], [1], [0, 0, 1, 1], [], []>} : vector<8x32xf32>, vector<32x256xf32>, vector<8x256xf32> -> vector<8x256xf32>
    %c40 = arith.constant 40 : index
    %c0_121 = arith.constant 0 : index
    %339 = vector.load %arg5[%c40, %c0_121] : memref<56x32xf32, #tpu.memory_space<vmem>>, vector<8x8xf32>
    %c48 = arith.constant 48 : index
    %c0_122 = arith.constant 0 : index
    %340 = vector.load %arg5[%c48, %c0_122] : memref<56x32xf32, #tpu.memory_space<vmem>>, vector<8x8xf32>
    %cst_123 = arith.constant dense<0.000000e+00> : vector<8xf32>
    %341 = vector.multi_reduction <add>, %0, %cst_123 [1] : vector<8x256xf32> to vector<8xf32>
    %342 = vector.shape_cast %341 : vector<8xf32> to vector<8x1xf32>
    %cst_124 = arith.constant 2.560000e+02 : f32
    %343 = vector.broadcast %cst_124 : f32 to vector<8x1xf32>
    %344 = arith.divf %342, %343 : vector<8x1xf32>
    %cst_125 = arith.constant dense<0.000000e+00> : vector<8x1xf32>
    %345 = tpu.matmul %339, %344, %cst_125 {dimension_numbers = #tpu.dot_dimension_numbers<[1], [0], [0], [1], [0, 0, 1, 1], [], []>} : vector<8x8xf32>, vector<8x1xf32>, vector<8x1xf32> -> vector<8x1xf32>
    %c0_126 = arith.constant 0 : index
    %c40_127 = arith.constant 40 : index
    %346 = vector.load %arg3[%c0_126, %c40_127] : memref<8x44xf32, #tpu.memory_space<vmem>>, vector<8x1xf32>
    %347 = arith.addf %345, %346 : vector<8x1xf32>
    %cst_128 = arith.constant 0.000000e+00 : f32
    %348 = vector.broadcast %cst_128 : f32 to vector<8x1xf32>
    %349 = arith.maximumf %347, %348 : vector<8x1xf32>
    %c0_129 = arith.constant 0 : index
    %c41 = arith.constant 41 : index
    %350 = vector.load %arg3[%c0_129, %c41] : memref<8x44xf32, #tpu.memory_space<vmem>>, vector<8x1xf32>
    %351 = arith.mulf %349, %350 : vector<8x1xf32>
    %c0_130 = arith.constant 0 : index
    %c42 = arith.constant 42 : index
    %352 = vector.load %arg3[%c0_130, %c42] : memref<8x44xf32, #tpu.memory_space<vmem>>, vector<8x1xf32>
    %353 = arith.addf %351, %352 : vector<8x1xf32>
    %cst_131 = arith.constant 0.000000e+00 : f32
    %354 = vector.broadcast %cst_131 : f32 to vector<8x1xf32>
    %355 = arith.maximumf %353, %354 : vector<8x1xf32>
    %cst_132 = arith.constant dense<0.000000e+00> : vector<8x1xf32>
    %356 = tpu.matmul %340, %355, %cst_132 {dimension_numbers = #tpu.dot_dimension_numbers<[1], [0], [0], [1], [0, 0, 1, 1], [], []>} : vector<8x8xf32>, vector<8x1xf32>, vector<8x1xf32> -> vector<8x1xf32>
    %357 = vector.broadcast %356 : vector<8x1xf32> to vector<8x256xf32>
    %358 = arith.addf %338, %357 : vector<8x256xf32>
    %c0_133 = arith.constant 0 : index
    %c43 = arith.constant 43 : index
    %359 = vector.load %arg3[%c0_133, %c43] : memref<8x44xf32, #tpu.memory_space<vmem>>, vector<8x1xf32>
    %360 = vector.broadcast %359 : vector<8x1xf32> to vector<8x256xf32>
    %361 = arith.addf %358, %360 : vector<8x256xf32>
    %cst_134 = arith.constant 0.000000e+00 : f32
    %362 = vector.broadcast %cst_134 : f32 to vector<8x256xf32>
    %363 = arith.maximumf %361, %362 : vector<8x256xf32>
    %c0_135 = arith.constant 0 : index
    %c0_136 = arith.constant 0 : index
    %364 = vector.load %arg6[%c0_135, %c0_136] : memref<8x256xf32, #tpu.memory_space<vmem>>, vector<8x256xf32>
    tpu.vector_store %arg6[%c0_135, %c0_136], %363 {strides = array<i32>} : memref<8x256xf32, #tpu.memory_space<vmem>>, vector<8x256xf32>,
    return
  }
  func.func @transform_0(%arg0: i32) -> (i32, i32) {
    %c0_i32 = arith.constant 0 : i32
    %c0_i32_0 = arith.constant 0 : i32
    return %arg0, %c0_i32 : i32, i32
  }
  func.func @transform_1(%arg0: i32) -> (i32, i32) {
    %c0_i32 = arith.constant 0 : i32
    %c0_i32_0 = arith.constant 0 : i32
    %c0_i32_1 = arith.constant 0 : i32
    return %c0_i32, %c0_i32_0 : i32, i32
  }
  func.func @transform_2(%arg0: i32) -> (i32, i32) {
    %c0_i32 = arith.constant 0 : i32
    %c0_i32_0 = arith.constant 0 : i32
    %c0_i32_1 = arith.constant 0 : i32
    return %c0_i32, %c0_i32_0 : i32, i32
  }
  func.func @transform_3(%arg0: i32) -> (i32, i32) {
    %c0_i32 = arith.constant 0 : i32
    %c0_i32_0 = arith.constant 0 : i32
    %c0_i32_1 = arith.constant 0 : i32
    return %c0_i32, %c0_i32_0 : i32, i32
  }
  func.func @transform_4(%arg0: i32) -> (i32, i32) {
    %c0_i32 = arith.constant 0 : i32
    %c0_i32_0 = arith.constant 0 : i32
    %c0_i32_1 = arith.constant 0 : i32
    return %c0_i32, %c0_i32_0 : i32, i32
  }
  func.func @transform_5(%arg0: i32) -> (i32, i32) {
    %c0_i32 = arith.constant 0 : i32
    %c0_i32_0 = arith.constant 0 : i32
    return %arg0, %c0_i32 : i32, i32
  }
}

</mosaic_0001>

<bundles_post_ra>
// kernel: tpu_custom_call.1
= control target key start
LH: loop header
LB: loop body
LE: loop exit
PB: predicated region body
PF: predicated region fallthrough
CT: control target
= control target key end

     0   :  { %v2750_v3 = vmov 1   ;;  %v2752_v5 = vmov 0   ;;  %v2748_v6 = vmov 2   ;;  %s2740_s0 = inlined_call_operand.vmem [shape: f32[8,256], index: 0, kind: input, shape index: {}]   ;;  %s2741_s1 = inlined_call_operand.vmem [shape: s32[2,256], index: 1, kind: input, shape index: {}]   ;;  %s2742_s2 = inlined_call_operand.vmem [shape: f32[8,44], index: 2, kind: input, shape index: {}]   ;;  %s2743_s3 = inlined_call_operand.vmem [shape: f32[32,3], index: 3, kind: input, shape index: {}]   ;;  %s2744_s4 = inlined_call_operand.vmem [shape: f32[56,32], index: 4, kind: input, shape index: {}]   ;;  %s2745_s5 = inlined_call_operand.hbm [shape: f32[8,256], index: 5, kind: output, shape index: {}]  }
   0x1   :  { %v1675_v0 = vld [vmem:[%s2742_s2] sm:$0xff]  ;;  %v1685_v2 = vld [vmem:[%s2740_s0 + $0x8] sm:$0xff]  ;;  %1502 = vset.pattern.permute.xlu1 %v2750_v3  ;;  %1501 = vset.pattern.permute.xlu0 %v2752_v5 }
   0x2   :  { %v1680_v1 = vld [vmem:[%s2740_s0] sm:$0xff]  ;;  %24 = vst [vmem:[#allocation2 + $0x18] sm:$0xff] %v1685_v2  ;;  %94 = vperm.xlu1 %1502, %v1675_v0  }
   0x3   :  { %v1134_v4 = vadd.f32 %v1685_v2, %v1680_v1  ;;  %23 = vst [vmem:[#allocation2 + $0x10] sm:$0xff] %v1680_v1 }
   0x5   :  { %1135 = vadd.xlane.f32.xlu0 %v1134_v4 }
   0x6   :  { %1503 = vset.pattern.permute.xlu1 %v2748_v6 }
   0x7   :  { %126 = vperm.xlu1 %1503, %v1675_v0  }
   0x8   :  { %10 = vsyncpa [#allocation4], 0  ;;  %v1583_v7 = vmov 3   ;;  %v1584_v8 = vmov 4   ;;  %v1585_v9 = vmov 5   ;;  %v1586_v10 = vmov 6  }
   0x9   :  { %v1587_v11 = vmov 14   ;;  %v1588_v12 = vmov 7   ;;  %v1589_v13 = vmov 18   ;;  %v1590_v14 = vmov 9   ;;  %s1601_s0 = smov 16   ;;  %s1604_s24 = smov 15  }
   0xa   :  { %v1591_v15 = vmov 21   ;;  %v1592_v16 = vmov 10   ;;  %v1593_v17 = vmov 24   ;;  %v1594_v18 = vmov 11   ;;  %s1606_s25 = smov 1   ;;  %s1608_s26 = smov 127  }
   0xb   :  { %1504 = vset.pattern.permute.xlu1 %v1583_v7  ;;  %v1595_v19 = vmov 28   ;;  %v1596_v20 = vmov 12   ;;  %v1597_v21 = vmov 31   ;;  %v1598_v22 = vmov 13   ;;  %s1609_s27 = smov 113   ;;  %s1611_s28 = smov 112  }
   0xc   :  { %156 = vperm.xlu1 %1504, %v1675_v0   ;;  %v1599_v23 = vmov 34   ;;  %v1600_v24 = vmov 15   ;;  %v1602_v25 = vmov 17   ;;  %v1603_v26 = vmov 16   ;;  %v1731_v30 = vld [vmem:[#allocation2 + $0x8] sm:$0xff]  ;;  %s1613_s29 = smov 17  }
   0xd   :  { %v1605_v27 = vmov 19   ;;  %v1607_v28 = vmov 20   ;;  %v1610_v29 = vmov 22   ;;  %v1612_v31 = vmov 23   ;;  %s1619_s30 = smov 64   ;;  %s1622_s6 = smov 60  }
   0xe   :  { %v1614_v32 = vmov 25   ;;  %v1615_v33 = vmov 27   ;;  %v2746_v34 = vmov 0.0   ;;  %v1617_v35 = vmov 29   ;;  %s1624_s7 = smov 4   ;;  %s1625_s8 = smov 124  }
   0xf   :  { %1413 = vmatprep.subr.mxu1 %v2746_v34  ;;  %1042 = vmatprep.mubr.f32.mxu0 %v2746_v34  ;;  %v1618_v36 = vmov 30   ;;  %v1620_v37 = vmov 36   ;;  %v1621_v38 = vmov 32   ;;  %v1623_v39 = vmov 33   ;;  %s1627_s9 = smov 68   ;;  %s1628_s10 = smov 8  }
  0x10   :  { %1505 = vset.pattern.permute.xlu1 %v1584_v8  ;;  %v1626_v40 = vmov 8   ;;  %s1629_s11 = smov 120   ;;  %v1781_v43 = vld [vmem:[#allocation2 + $0x20] sm:$0xff]  ;;  %v1630_v52 = vmov 26   ;;  %v1631_v58 = vmov 37   ;;  %v1632_v60 = vmov 39  }
  0x11   :  { %162 = vperm.xlu1 %1505, %v1675_v0   ;;  %2789 = vst [vmem:[#allocation6_spill] sm:$0xff] %v1781_v43  ;;  %s1633_s12 = smov 111   ;;  %vm2787_vm0 = vcmask 64512   ;;  %vm1634_vm1 = vmmov 0   ;;  %v1132_v4 = vld [vmem:[%s2744_s4 + $0x28] sm:$0xff]  ;;  %vm118_vm2 = vcmask 121856  }
  0x12   :  { %1415 = vmatprep.mubr.msk.f32.mxu1 %vm1634_vm1, %v2746_v34  ;;  %vm190_vm3 = vcmask 1039360   ;;  %vm252_vm4 = vcmask 916480   ;;  %vm54_vm9 = vcmask 138240   ;;  %vm86_vm12 = vcmask 130048   ;;  %s1638_s19 = smov 87   ;;  %s1639_s20 = smov 86  }
  0x13   :  { %s1641_s15 = smov [#allocation3]  }
  0x14   :  { %s1393_s16 = sshll.u32 %s1641_s15, 4  ;;  %s1394_s16 = int_to_ptr.vmem [resolvable:$true] %s1393_s16 }
  0x15   :  { %1506 = vset.pattern.permute.xlu1 %v1585_v9  ;;  %s1556_s17 = scalar_lea.vmem %s1394_s16, 256  ;;  %p1561_p1 = scmp.lt.s32.totalorder %s1394_s16, %s1394_s16 }
  0x16   :  { %198 = vperm.xlu1 %1506, %v1675_v0   ;;  %p1557_p0 = scmp.ne.s32.totalorder %s1394_s16, %s1556_s17  ;;  %p1562_p2 = scmp.lt.s32.totalorder %s1556_s17, %s1556_s17 }
  0x18   :  { %p1563_p3 = por %p1562_p2, %p1561_p1 }
  0x1a   :  { %1507 = vset.pattern.permute.xlu1 %v1586_v10  ;;  %p1564_p4 = pnand %p1563_p3, %p1557_p0 }
  0x1b   :  { %64 = vperm.xlu0 %1501, %v1675_v0   ;;  %230 = vperm.xlu1 %1507, %v1675_v0  }
  0x1f   :  { %1514 = vset.pattern.permute.xlu0 %v1587_v11  ;;  %1508 = vset.pattern.permute.xlu1 %v1588_v12 }
  0x20   :  { %351 = vperm.xlu0 %1514, %v1675_v0   ;;  %260 = vperm.xlu1 %1508, %v1675_v0  }
  0x24   :  { %1517 = vset.pattern.permute.xlu0 %v1589_v13  ;;  %1509 = vset.pattern.permute.xlu1 %v1590_v14 }
  0x25   :  { %426 = vperm.xlu0 %1517, %v1675_v0   ;;  %321 = vperm.xlu1 %1509, %v1675_v0  }
  0x29   :  { %1520 = vset.pattern.permute.xlu0 %v1591_v15  ;;  %1510 = vset.pattern.permute.xlu1 %v1592_v16 }
  0x2a   :  { %518 = vperm.xlu0 %1520, %v1675_v0   ;;  %327 = vperm.xlu1 %1510, %v1675_v0  }
  0x2e   :  { %1523 = vset.pattern.permute.xlu0 %v1593_v17  ;;  %1511 = vset.pattern.permute.xlu1 %v1594_v18 }
  0x2f   :  { %585 = vperm.xlu0 %1523, %v1675_v0   ;;  %333 = vperm.xlu1 %1511, %v1675_v0  }
  0x33   :  { %1526 = vset.pattern.permute.xlu0 %v1595_v19  ;;  %1512 = vset.pattern.permute.xlu1 %v1596_v20 }
  0x34   :  { %726 = vperm.xlu0 %1526, %v1675_v0   ;;  %339 = vperm.xlu1 %1512, %v1675_v0  }
  0x38   :  { %1529 = vset.pattern.permute.xlu0 %v1597_v21  ;;  %1513 = vset.pattern.permute.xlu1 %v1598_v22 }
  0x39   :  { %793 = vperm.xlu0 %1529, %v1675_v0   ;;  %345 = vperm.xlu1 %1513, %v1675_v0  }
  0x3d   :  { %1532 = vset.pattern.permute.xlu0 %v1599_v23  ;;  %1515 = vset.pattern.permute.xlu1 %v1600_v24 }
  0x3e   :  { %872 = vperm.xlu0 %1532, %v1675_v0   ;;  %357 = vperm.xlu1 %1515, %v1675_v0  }
  0x42   :  { %82 = vrot.lane.b32.xlu0 %v1680_v1, %s1601_s0  ;;  %1516 = vset.pattern.permute.xlu1 %v1603_v26 }
  0x43   :  { %1534 = vset.pattern.permute.xlu0 %v1602_v25  ;;  %363 = vperm.xlu1 %1516, %v1675_v0  }
  0x46   :  { %114 = vrot.lane.b32.xlu0 %v1680_v1, %s1604_s24 }
  0x47   :  { %1518 = vset.pattern.permute.xlu1 %v1605_v27 }
  0x48   :  { %456 = vperm.xlu1 %1518, %v1675_v0  }
  0x4a   :  { %144 = vrot.lane.b32.xlu0 %v1680_v1, %s1606_s25 }
  0x4c   :  { %1519 = vset.pattern.permute.xlu1 %v1607_v28 }
  0x4d   :  { %488 = vperm.xlu1 %1519, %v1675_v0  }
  0x4e   :  { %186 = vrot.lane.b32.xlu0 %v1685_v2, %s1608_s26 }
  0x51   :  { %1521 = vset.pattern.permute.xlu1 %v1610_v29  ;;  %v1635_v29 = vmov 35  }
  0x52   :  { %218 = vrot.lane.b32.xlu0 %v1685_v2, %s1609_s27  ;;  %524 = vperm.xlu1 %1521, %v1675_v0  }
  0x56   :  { %248 = vrot.lane.b32.xlu0 %v1685_v2, %s1611_s28  ;;  %1522 = vset.pattern.permute.xlu1 %v1612_v31 }
  0x57   :  { %554 = vperm.xlu1 %1522, %v1675_v0  }
  0x5a   :  { %48 = vrot.lane.b32.xlu0 %v1731_v30, %s1613_s29 }
  0x5b   :  { %1524 = vset.pattern.permute.xlu1 %v1614_v32 }
  0x5c   :  { %614 = vperm.xlu1 %1524, %v1675_v0  }
  0x5e   :  { %112 = vrot.lane.b32.xlu0 %v1731_v30, %s1604_s24 }
  0x60   :  { %1525 = vset.pattern.permute.xlu1 %v1615_v33 }
  0x61   :  { %707 = vperm.xlu1 %1525, %v1675_v0  }
  0x62   :  { %184 = vrot.lane.b32.xlu0 %v1680_v1, %s1608_s26 }
  0x65   :  { %1527 = vset.pattern.permute.xlu1 %v1617_v35 }
  0x66   :  { %246 = vrot.lane.b32.xlu0 %v1680_v1, %s1611_s28  ;;  %758 = vperm.xlu1 %1527, %v1675_v0  }
  0x6a   :  { %369 = vperm.xlu0 %1534, %v1675_v0   ;;  %1528 = vset.pattern.permute.xlu1 %v1618_v36 }
  0x6b   :  { %787 = vperm.xlu1 %1528, %v1675_v0  }
  0x6e   :  { %444 = vrot.lane.b32.xlu0 %v1680_v1, %s1619_s30 }
  0x6f   :  { %1535 = vset.pattern.permute.xlu0 %v1620_v37  ;;  %1530 = vset.pattern.permute.xlu1 %v1621_v38  ;;  %v673_v38 = vld [vmem:[#allocation2] sm:$0xff] }
  0x70   :  { %822 = vperm.xlu1 %1530, %v1675_v0  }
  0x72   :  { %476 = vrot.lane.b32.xlu0 %v1680_v1, %s1622_s6 }
  0x74   :  { %1531 = vset.pattern.permute.xlu1 %v1623_v39  ;;  %v35_v39 = vlaneseq }
  0x75   :  { %853 = vperm.xlu1 %1531, %v1675_v0  }
  0x76   :  { %506 = vrot.lane.b32.xlu0 %v1680_v1, %s1624_s7 }
  0x79   :  { %50 = vrot.lane.b32.xlu1 %v1680_v1, %s1613_s29 }
  0x7a   :  { %542 = vrot.lane.b32.xlu0 %v1685_v2, %s1625_s8  ;;  %1533 = vset.pattern.permute.xlu1 %v1626_v40 }
  0x7d   :  { %52 = vrot.lane.b32.xlu1 %v1685_v2, %s1613_s29 }
  0x7e   :  { %574 = vrot.lane.b32.xlu0 %v1685_v2, %s1627_s9 }
  0x81   :  { %v1767_v41 = vpop.permute.xlu1 %94  ;;  %84 = vrot.lane.b32.xlu1 %v1685_v2, %s1601_s0 }
  0x82   :  { %603 = vrot.lane.b32.xlu0 %v1685_v2, %s1619_s30 }
  0x85   :  { %116 = vrot.lane.b32.xlu1 %v1685_v2, %s1604_s24 }
  0x86   :  { %695 = vrot.lane.b32.xlu0 %v1731_v30, %s1628_s10  ;;  %v1775_v42 = vpop.permute.xlu1 %126 }
  0x89   :  { %146 = vrot.lane.b32.xlu1 %v1685_v2, %s1606_s25 }
  0x8a   :  { %746 = vrot.lane.b32.xlu0 %v1680_v1, %s1629_s11 }
  0x8b   :  { %v1783_v44 = vpop.permute.xlu1 %156 }
  0x8d   :  { %188 = vrot.lane.b32.xlu1 %v1781_v43, %s1608_s26 }
  0x8e   :  { %776 = vrot.lane.b32.xlu0 %v1680_v1, %s1628_s10 }
  0x90   :  { %v1789_v45 = vpop.permute.xlu1 %162 }
  0x91   :  { %220 = vrot.lane.b32.xlu1 %v1781_v43, %s1609_s27 }
  0x92   :  { %811 = vrot.lane.b32.xlu0 %v1685_v2, %s1629_s11  ;;  %v1136_v46 = vpop.xlane.xlu0 %1135 }
  0x93   :  { %v1138_v47 = vmul.f32 0.00390625, %v1136_v46 }
  0x95   :  { %1414 = vmatpush3.msra.mxu1 %v1138_v47  ;;  %v1798_v48 = vpop.permute.xlu1 %198  ;;  %250 = vrot.lane.b32.xlu1 %v1781_v43, %s1611_s28  ;;  %v1959_v47 = vld [vmem:[%s2741_s1] ss:$2 sm:$0x3] }
  0x96   :  { %842 = vrot.lane.b32.xlu0 %v1685_v2, %s1628_s10  ;;  %1418 = vmatprep.subr.mxu1 %v2746_v34  ;;  %vm31_vm6 = vcmp.ge.s32.totalorder %v1959_v47, 1  ;;  %vm203_vm15 = vcmp.lt.s32.totalorder %v1959_v47, 15 }
  0x97   :  { %1416 = vmatmul.mubr.msk.f32.vlgmr.msra.gmra.mrb[0].mxu1 %vm2787_vm0, %v1132_v4 }
  0x98   :  { %1420 = vmatprep.mubr.msk.f32.mxu1 %vm1634_vm1, %v2746_v34  ;;  %vm148_vm1 = vcmask 7168  }
  0x99   :  { %80 = vrot.lane.b32.xlu1 %v1731_v30, %s1601_s0 }
  0x9a   :  { %313 = vperm.xlu0 %1535, %v1675_v0   ;;  %v1803_v49 = vpop.permute.xlu0 %64  ;;  %v1807_v50 = vpop.permute.xlu1 %230 }
  0x9d   :  { %142 = vrot.lane.b32.xlu1 %v1731_v30, %s1606_s25 }
  0x9e   :  { %442 = vrot.lane.b32.xlu0 %v1731_v30, %s1619_s30 }
  0x9f   :  { %v1813_v51 = vpop.permute.xlu0 %351  ;;  %1537 = vset.pattern.permute.xlu0 %v1630_v52  ;;  %v1815_v53 = vpop.permute.xlu1 %260  ;;  %v1964_v52 = vld [vmem:[%s2741_s1 + $0x1] ss:$2 sm:$0x3]  ;;  %s1637_s1 = smov 88  }
  0xa0   :  { %vm32_vm5 = vcmp.ge.s32.totalorder %v1964_v52, 1  ;;  %vm99_vm8 = vcmp.lt.s32.totalorder %v1964_v52, 15 }
  0xa1   :  { %216 = vrot.lane.b32.xlu1 %v1680_v1, %s1609_s27  ;;  %vm33_vm7 = vmand %vm31_vm6, %vm32_vm5 }
  0xa2   :  { %504 = vrot.lane.b32.xlu0 %v1731_v30, %s1624_s7  ;;  %vm100_vm10 = vmand %vm31_vm6, %vm99_vm8 }
  0xa4   :  { %v1821_v54 = vpop.permute.xlu0 %426  ;;  %v1823_v55 = vpop.permute.xlu1 %321 }
  0xa5   :  { %2790 = vst [vmem:[#allocation7_spill] sm:$0xff] %v1821_v54  ;;  %291 = vperm.xlu1 %1533, %v1675_v0  }
  0xa6   :  { %572 = vrot.lane.b32.xlu0 %v1680_v1, %s1627_s9 }
  0xa9   :  { %v1828_v56 = vpop.permute.xlu0 %518  ;;  %v1831_v57 = vpop.permute.xlu1 %327  ;;  %414 = vrot.lane.b32.xlu1 %v1680_v1, %s1627_s9 }
  0xaa   :  { %2791 = vst [vmem:[#allocation8_spill] sm:$0xff] %v1828_v56  ;;  %644 = vperm.xlu0 %1537, %v1675_v0   ;;  %1536 = vset.pattern.permute.xlu1 %v1631_v58  ;;  %v1968_v58 = vshrl.u32 %v35_v39, 7 }
  0xad   :  { %416 = vrot.lane.b32.xlu1 %v1685_v2, %s1627_s9 }
  0xae   :  { %v1835_v59 = vpop.permute.xlu0 %585  ;;  %774 = vrot.lane.b32.xlu0 %v1731_v30, %s1628_s10  ;;  %v1841_v61 = vpop.permute.xlu1 %333 }
  0xaf   :  { %2792 = vst [vmem:[#allocation9_spill] sm:$0xff] %v1835_v59  ;;  %1540 = vset.pattern.permute.xlu0 %v1632_v60 }
  0xb1   :  { %446 = vrot.lane.b32.xlu1 %v1685_v2, %s1619_s30 }
  0xb2   :  { %840 = vrot.lane.b32.xlu0 %v1680_v1, %s1628_s10 }
  0xb3   :  { %v1847_v62 = vpop.permute.xlu0 %726  ;;  %v1849_v63 = vpop.permute.xlu1 %339 }
  0xb4   :  { %2793 = vst [vmem:[#allocation10_spill] sm:$0xff] %v1847_v62 }
  0xb5   :  { %478 = vrot.lane.b32.xlu1 %v1685_v2, %s1622_s6 }
  0xb6   :  { %279 = vrot.lane.b32.xlu0 %v1685_v2, %s1633_s12 }
  0xb8   :  { %v1859_v7 = vpop.permute.xlu0 %793  ;;  %v1863_v8 = vpop.permute.xlu1 %345 }
  0xb9   :  { %2794 = vst [vmem:[#allocation11_spill] sm:$0xff] %v1859_v7  ;;  %508 = vrot.lane.b32.xlu1 %v1685_v2, %s1624_s7 }
  0xba   :  { %277 = vrot.lane.b32.xlu0 %v1680_v1, %s1633_s12 }
  0xbd   :  { %v1869_v9 = vpop.permute.xlu0 %872  ;;  %v1872_v10 = vpop.permute.xlu1 %357  ;;  %544 = vrot.lane.b32.xlu1 %v1781_v43, %s1625_s8 }
  0xbe   :  { %2795 = vst [vmem:[#allocation12_spill] sm:$0xff] %v1869_v9  ;;  %930 = vperm.xlu0 %1540, %v1675_v0  }
  0xc1   :  { %v1876_v11 = vpop.permute.xlu0 %82  ;;  %576 = vrot.lane.b32.xlu1 %v1781_v43, %s1627_s9 }
  0xc2   :  { %897 = vrot.lane.b32.xlu0 %v1781_v43, %s1629_s11  ;;  %v1883_v12 = vpop.permute.xlu1 %363 }
  0xc3   :  { %1542 = vset.pattern.permute.xlu0 %v2752_v5 }
  0xc5   :  { %v1885_v13 = vpop.permute.xlu0 %114  ;;  %605 = vrot.lane.b32.xlu1 %v1781_v43, %s1619_s30 }
  0xc6   :  { %631 = vrot.lane.b32.xlu0 %v1680_v1, %s1622_s6 }
  0xc7   :  { %v1891_v14 = vpop.permute.xlu1 %456 }
  0xc8   :  { %2796 = vst [vmem:[#allocation13_spill] sm:$0xff] %v1891_v14 }
  0xc9   :  { %v1893_v15 = vpop.permute.xlu0 %144  ;;  %697 = vrot.lane.b32.xlu1 %v1680_v1, %s1628_s10 }
  0xca   :  { %1139 = vrot.lane.b32.xlu0 %v1675_v0, %s1637_s1 }
  0xcc   :  { %v1899_v17 = vpop.permute.xlu1 %488 }
  0xcd   :  { %v1897_v16 = vpop.permute.xlu0 %186  ;;  %2797 = vst [vmem:[#allocation14_spill] sm:$0xff] %v1899_v17  ;;  %748 = vrot.lane.b32.xlu1 %v1685_v2, %s1629_s11 }
  0xce   :  { %1220 = vrot.lane.b32.xlu0 %v1675_v0, %s1639_s20 }
  0xd1   :  { %v1903_v18 = vpop.permute.xlu0 %218  ;;  %v1905_v19 = vpop.permute.xlu1 %524  ;;  %778 = vrot.lane.b32.xlu1 %v1685_v2, %s1628_s10 }
  0xd2   :  { %2798 = vst [vmem:[#allocation15_spill] sm:$0xff] %v1905_v19 }
  0xd5   :  { %v1909_v20 = vpop.permute.xlu0 %248  ;;  %813 = vrot.lane.b32.xlu1 %v1781_v43, %s1629_s11 }
  0xd6   :  { %v1913_v21 = vpop.permute.xlu1 %554 }
  0xd7   :  { %2799 = vst [vmem:[#allocation16_spill] sm:$0xff] %v1913_v21 }
  0xd9   :  { %v1915_v22 = vpop.permute.xlu0 %48  ;;  %844 = vrot.lane.b32.xlu1 %v1781_v43, %s1628_s10 }
  0xdb   :  { %v1919_v23 = vpop.permute.xlu1 %614 }
  0xdc   :  { %2800 = vst [vmem:[#allocation17_spill] sm:$0xff] %v1919_v23 }
  0xdd   :  { %v113_v24 = vpop.permute.xlu0 %112  ;;  %391 = vperm.xlu1 %1536, %v1675_v0  }
  0xde   :  { %v1923_v25 = vsel %vm118_vm2, %v113_v24, %v1885_v13  ;;  %v1976_v24 = vsub.s32 1, %v1968_v58 }
  0xe0   :  { %v1930_v28 = vpop.permute.xlu1 %707 }
  0xe1   :  { %v185_v26 = vpop.permute.xlu0 %184  ;;  %2801 = vst [vmem:[#allocation18_spill] sm:$0xff] %v1930_v28  ;;  %412 = vrot.lane.b32.xlu1 %v1731_v30, %s1627_s9 }
  0xe2   :  { %v1928_v27 = vsel %vm190_vm3, %v185_v26, %v1897_v16  ;;  %1538 = vset.pattern.permute.xlu1 %v1635_v29  ;;  %v1987_v29 = vsel %vm33_vm7, 1, %v2752_v5  ;;  %vm204_vm7 = vmand %vm203_vm15, %vm32_vm5 }
  0xe5   :  { %v247_v31 = vpop.permute.xlu0 %246  ;;  %v1938_v33 = vpop.permute.xlu1 %758  ;;  %474 = vrot.lane.b32.xlu1 %v1731_v30, %s1622_s6 }
  0xe6   :  { %v1936_v32 = vsel %vm252_vm4, %v247_v31, %v1909_v20  ;;  %2802 = vst [vmem:[#allocation19_spill] sm:$0xff] %v1938_v33 }
  0xe9   :  { %v1942_v35 = vpop.permute.xlu0 %369  ;;  %540 = vrot.lane.b32.xlu1 %v1680_v1, %s1625_s8 }
  0xea   :  { %2803 = vst [vmem:[#allocation20_spill] sm:$0xff] %v1942_v35  ;;  %v1946_v36 = vpop.permute.xlu1 %787 }
  0xeb   :  { %2804 = vst [vmem:[#allocation21_spill] sm:$0xff] %v1946_v36  ;;  %v1636_v36 = vmov 38  }
  0xed   :  { %v1948_v37 = vpop.permute.xlu0 %444  ;;  %601 = vrot.lane.b32.xlu1 %v1680_v1, %s1619_s30 }
  0xee   :  { %2805 = vst [vmem:[#allocation22_spill] sm:$0xff] %v1948_v37 }
  0xef   :  { %v1952_v40 = vpop.permute.xlu1 %822 }
  0xf0   :  { %2806 = vst [vmem:[#allocation23_spill] sm:$0xff] %v1952_v40 }
  0xf1   :  { %v1954_v46 = vpop.permute.xlu0 %476  ;;  %693 = vrot.lane.b32.xlu1 %v673_v38, %s1628_s10  ;;  %v1994_v38 = vsel %vm31_vm6, 1, %v2752_v5 }
  0xf2   :  { %2807 = vst [vmem:[#allocation24_spill] sm:$0xff] %v1954_v46  ;;  %v77_v34 = vrot.slane %v1994_v38, %v1976_v24 }
  0xf4   :  { %v1973_v4 = vpop.permute.xlu1 %853  ;;  %vm79_vm13 = vcmp.eq.s32.totalorder %v77_v34, 1 }
  0xf5   :  { %v1970_v60 = vpop.permute.xlu0 %506  ;;  %2809 = vst [vmem:[#allocation26_spill] sm:$0xff] %v1973_v4  ;;  %744 = vrot.lane.b32.xlu1 %v1731_v30, %s1629_s11  ;;  %v42_v30 = vrot.slane %v1987_v29, %v1976_v24  ;;  %v2813_v4 = vmov 0  }
  0xf6   :  { %2808 = vst [vmem:[#allocation25_spill] sm:$0xff] %v1970_v60  ;;  %v2017_v9 = vsel %vm32_vm5, 1, %v2813_v4  ;;  %v2020_v7 = vsel %vm100_vm10, 1, %v2813_v4  ;;  %vm222_vm5 = vcmask 924672  }
  0xf7   :  { %vm44_vm11 = vcmp.eq.s32.totalorder %v42_v30, 1  ;;  %v139_v35 = vrot.slane %v2017_v9, %v1976_v24 }
  0xf8   :  { %v1989_v31 = vpop.permute.xlu1 %50 }
  0xf9   :  { %v1984_v26 = vpop.permute.xlu0 %542  ;;  %809 = vrot.lane.b32.xlu1 %v1680_v1, %s1629_s11  ;;  %vm141_vm6 = vcmp.eq.s32.totalorder %v139_v35, 1 }
  0xfa   :  { %2810 = vst [vmem:[#allocation27_spill] sm:$0xff] %v1984_v26 }
  0xfc   :  { %v53_v6 = vpop.permute.xlu1 %52 }
  0xfd   :  { %v2001_v39 = vpop.permute.xlu0 %574  ;;  %v56_v3 = vsel %vm54_vm9, %v1989_v31, %v53_v6  ;;  %908 = vperm.xlu1 %1538, %v1675_v0   ;;  %v109_v6 = vrot.slane %v2020_v7, %v1976_v24 }
  0xfe   :  { %2811 = vst [vmem:[#allocation28_spill] sm:$0xff] %v2001_v39  ;;  %v60_v40 = vsel %vm44_vm11, %v56_v3, 0.0 }
  0xff   :  { %v68_v28 = vmul.f32 %v1803_v49, %v60_v40  ;;  %v325_v3 = vmul.f32 %v1823_v55, %v60_v40  ;;  %vm111_vm14 = vcmp.eq.s32.totalorder %v109_v6, 1  ;;  %v2055_v6 = vsel %vm204_vm7, 1, %v2813_v4 }
 0x100   :  { %v85_v33 = vpop.permute.xlu1 %84  ;;  %v213_v26 = vrot.slane %v2055_v6, %v1976_v24  ;;  %vm399_vm7 = vcmp.ge.s32.totalorder %v1964_v52, 4 }
 0x101   :  { %v2012_v5 = vpop.permute.xlu0 %603  ;;  %v88_v30 = vsel %vm86_vm12, %v1876_v11, %v85_v33  ;;  %281 = vrot.lane.b32.xlu1 %v1781_v43, %s1633_s12 }
 0x102   :  { %2812 = vst [vmem:[#allocation29_spill] sm:$0xff] %v2012_v5  ;;  %v92_v34 = vsel %vm79_vm13, %v88_v30, 0.0  ;;  %1539 = vset.pattern.permute.xlu1 %v1636_v36 }
 0x103   :  { %v98_v62 = vmul.f32 %v1767_v41, %v92_v34  ;;  %v331_v33 = vmul.f32 %v1831_v57, %v92_v34 }
 0x104   :  { %v117_v59 = vpop.permute.xlu1 %116 }
 0x105   :  { %v2034_v23 = vpop.permute.xlu0 %695  ;;  %v297_v19 = vadd.f32 %v98_v62, %v68_v28  ;;  %v375_v5 = vadd.f32 %v331_v33, %v325_v3  ;;  %v120_v36 = vsel %vm118_vm2, %v1885_v13, %v117_v59  ;;  %666 = vperm.xlu1 %1539, %v1675_v0   ;;  %v170_v28 = vsel %vm99_vm8, 1, %v2813_v4 }
 0x106   :  { %2814 = vst [vmem:[#allocation30_spill] sm:$0xff] %v2034_v23  ;;  %v124_v40 = vsel %vm111_vm14, %v120_v36, 0.0  ;;  %v178_v35 = vrot.slane %v170_v28, %v1976_v24 }
 0x107   :  { %v130_v34 = vmul.f32 %v1775_v42, %v124_v40  ;;  %v337_v3 = vmul.f32 %v1841_v61, %v124_v40  ;;  %v235_v40 = vsel %vm203_vm15, 1, %v2813_v4 }
 0x108   :  { %v147_v62 = vpop.permute.xlu1 %146  ;;  %vm180_vm2 = vcmp.eq.s32.totalorder %v178_v35, 1 }
 0x109   :  { %v2040_v30 = vpop.permute.xlu0 %746  ;;  %v150_v59 = vsel %vm148_vm1, %v1893_v15, %v147_v62  ;;  %633 = vrot.lane.b32.xlu1 %v1685_v2, %s1622_s6 }
 0x10a   :  { %2815 = vst [vmem:[#allocation31_spill] sm:$0xff] %v2040_v30  ;;  %v154_v13 = vsel %vm141_vm6, %v150_v59, 0.0  ;;  %1541 = vset.pattern.permute.xlu1 %v2813_v4  ;;  %v2065_v30 = vsub.s32 0, %v1968_v58  ;;  %v879_v58 = vld [vmem:[#allocation2 + $0x28] sm:$0xff] }
 0x10b   :  { %v160_v33 = vmul.f32 %v1783_v44, %v154_v13  ;;  %v343_v36 = vmul.f32 %v1849_v63, %v154_v13 }
 0x10c   :  { %v189_v59 = vpop.permute.xlu1 %188  ;;  %v38_v13 = vrot.slane %v1987_v29, %v2065_v30 }
 0x10d   :  { %v2062_v62 = vpop.permute.xlu0 %776  ;;  %v299_v23 = vadd.f32 %v160_v33, %v130_v34  ;;  %v377_v21 = vadd.f32 %v343_v36, %v337_v3  ;;  %v192_v39 = vsel %vm190_vm3, %v1897_v16, %v189_v59  ;;  %635 = vrot.lane.b32.xlu1 %v1781_v43, %s1622_s6  ;;  %v243_v33 = vrot.slane %v235_v40, %v1976_v24 }
 0x10e   :  { %2816 = vst [vmem:[#allocation32_spill] sm:$0xff] %v2062_v62  ;;  %v105_v36 = vrot.slane %v2020_v7, %v2065_v30  ;;  %v174_v43 = vrot.slane %v170_v28, %v2065_v30  ;;  %v196_v35 = vsel %vm180_vm2, %v192_v39, 0.0  ;;  %vm215_vm3 = vcmp.eq.s32.totalorder %v213_v26, 1 }
 0x10f   :  { %v2078_v34 = vadd.f32 %v299_v23, %v297_v19  ;;  %v2080_v3 = vadd.f32 %v377_v21, %v375_v5  ;;  %v73_v5 = vrot.slane %v1994_v38, %v2065_v30  ;;  %vm43_vm10 = vcmp.eq.s32.totalorder %v38_v13, 1 }
 0x110   :  { %v221_v59 = vpop.permute.xlu1 %220  ;;  %v55_v19 = vsel %vm54_vm9, %v1915_v22, %v1989_v31  ;;  %vm245_vm11 = vcmp.eq.s32.totalorder %v243_v33, 1  ;;  %vm2096_vm13 = vcmp.eq.s32.totalorder %v105_v36, 1  ;;  %v202_v21 = vmul.f32 %v1798_v48, %v196_v35 }
 0x111   :  { %v2082_v16 = vpop.permute.xlu0 %811  ;;  %v224_v62 = vsel %vm222_vm5, %v1903_v18, %v221_v59  ;;  %899 = vrot.lane.b32.xlu1 %v879_v58, %s1629_s11  ;;  %v135_v39 = vrot.slane %v2017_v9, %v2065_v30  ;;  %v166_v38 = vmul.f32 %v1789_v45, %v1685_v2  ;;  %vm2107_vm14 = vcmp.eq.s32.totalorder %v174_v43, 1 }
 0x112   :  { %v228_v23 = vsel %vm215_vm3, %v224_v62, 0.0  ;;  %v355_v22 = vmul.f32 %v1813_v51, %v196_v35  ;;  %v349_v62 = vmul.f32 %v1863_v8, %v1685_v2  ;;  %v59_v58 = vsel %vm43_vm10, %v55_v19, 0.0 }
 0x113   :  { %vm2118_vm9 = vcmp.eq.s32.totalorder %v73_v5, 1  ;;  %v234_v43 = vmul.f32 %v1807_v50, %v228_v23  ;;  %v361_v33 = vmul.f32 %v1872_v10, %v228_v23  ;;  %v239_v59 = vrot.slane %v235_v40, %v2065_v30 }
 0x114   :  { %v251_v29 = vpop.permute.xlu1 %250  ;;  %v301_v35 = vadd.f32 %v202_v21, %v166_v38  ;;  %v209_v5 = vrot.slane %v2055_v6, %v2065_v30  ;;  %v379_v19 = vadd.f32 %v355_v22, %v349_v62  ;;  %v123_v40 = vsel %vm2096_vm13, %v1923_v25, 0.0 }
 0x115   :  { %v2101_v26 = vpop.permute.xlu0 %842  ;;  %v254_v31 = vsel %vm252_vm4, %v1909_v20, %v251_v29  ;;  %895 = vrot.lane.b32.xlu1 %v1685_v2, %s1629_s11  ;;  %vm2127_vm4 = vcmp.eq.s32.totalorder %v135_v39, 1  ;;  %v67_v21 = vmul.f32 %v1803_v49, %v59_v58  ;;  %v324_v39 = vmul.f32 %v1823_v55, %v59_v58 }
 0x116   :  { %v258_v9 = vsel %vm245_vm11, %v254_v31, 0.0  ;;  %vm2148_vm6 = vcmp.eq.s32.totalorder %v209_v5, 1  ;;  %v195_v55 = vsel %vm2107_vm14, %v1928_v27, 0.0  ;;  %vm418_vm10 = vcmask 556032  }
 0x117   :  { %v264_v36 = vmul.f32 %v1815_v53, %v258_v9  ;;  %v367_v20 = vmul.f32 %v1883_v12, %v258_v9  ;;  %vm448_vm14 = vcmask 523264  }
 0x118   :  { %v81_v29 = vpop.permute.xlu1 %80 }
 0x119   :  { %v303_v23 = vadd.f32 %v264_v36, %v234_v43  ;;  %v381_v31 = vadd.f32 %v367_v20, %v361_v33  ;;  %v87_v9 = vsel %vm86_vm12, %v81_v29, %v1876_v11  ;;  %v2141_v38 = vpop.permute.xlu0 %313  ;;  %1216 = vrot.lane.b32.xlu1 %v1675_v0, %s1638_s19  ;;  %vm244_vm12 = vcmp.eq.s32.totalorder %v239_v59, 1 }
 0x11a   :  { %v91_v6 = vsel %vm2118_vm9, %v87_v9, 0.0  ;;  %v336_v0 = vmul.f32 %v1841_v61, %v123_v40  ;;  %v257_v27 = vsel %vm244_vm12, %v1936_v32, 0.0  ;;  %v354_v61 = vmul.f32 %v1813_v51, %v195_v55 }
 0x11b   :  { %v307_v22 = vadd.f32 %v303_v23, %v301_v35  ;;  %v385_v62 = vadd.f32 %v381_v31, %v379_v19  ;;  %v97_v11 = vmul.f32 %v1767_v41, %v91_v6  ;;  %v330_v43 = vmul.f32 %v1831_v57, %v91_v6 }
 0x11c   :  { %v143_v25 = vpop.permute.xlu1 %142  ;;  %v129_v57 = vmul.f32 %v1775_v42, %v123_v40  ;;  %v165_v42 = vmul.f32 %v1789_v45, %v1680_v1  ;;  %v263_v45 = vmul.f32 %v1815_v53, %v257_v27  ;;  %vm480_vm9 = vcmask 490496  }
 0x11d   :  { %v296_v7 = vadd.f32 %v97_v11, %v67_v21  ;;  %v374_v58 = vadd.f32 %v330_v43, %v324_v39  ;;  %v149_v41 = vsel %vm148_vm1, %v143_v25, %v1893_v15  ;;  %v2162_v33 = vadd.f32 %v307_v22, %v2078_v34  ;;  %v2175_v34 = vpop.permute.xlu0 %442 }
 0x11e   :  { %v153_v13 = vsel %vm2127_vm4, %v149_v41, 0.0  ;;  %v2165_v36 = vadd.f32 %v385_v62, %v2080_v3  ;;  %v201_v15 = vmul.f32 %v1798_v48, %v195_v55  ;;  %vm398_vm1 = vcmp.ge.s32.totalorder %v1959_v47, 4  ;;  %2829 = vst [vmem:[#allocation35_spill] sm:$0xff] %v2175_v34  ;;  %v2873_v34 = vld [vmem:[#allocation6_spill] sm:$0xff] }
 0x11f   :  { %2827 = vst [vmem:[#allocation33_spill] sm:$0xff] %v2162_v33  ;;  %v159_v28 = vmul.f32 %v1783_v44, %v153_v13  ;;  %v342_v20 = vmul.f32 %v1849_v63, %v153_v13  ;;  %v348_v63 = vmul.f32 %v1863_v8, %v1680_v1  ;;  %v366_v48 = vmul.f32 %v1883_v12, %v257_v27  ;;  %vm400_vm2 = vmand %vm398_vm1, %vm399_vm7  ;;  %v942_v13 = vld [vmem:[%s2743_s3 + $0x8] sm:$0xff]  ;;  %v2875_v33 = vld [vmem:[#allocation21_spill] sm:$0xff] }
 0x120   :  { %2828 = vst [vmem:[#allocation34_spill] sm:$0xff] %v2165_v36  ;;  %v217_v3 = vpop.permute.xlu1 %216  ;;  %v300_v1 = vadd.f32 %v201_v15, %v165_v42  ;;  %v2198_v23 = vsel %vm400_vm2, 1, %v2813_v4  ;;  %v2212_v39 = vsel %vm398_vm1, 1, %v2813_v4  ;;  %952 = vperm.xlu0 %1542, %v942_v13   ;;  %vm559_vm12 = vcmp.lt.s32.totalorder %v1959_v47, 12 }
 0x121   :  { %v298_v59 = vadd.f32 %v159_v28, %v129_v57  ;;  %v376_v32 = vadd.f32 %v342_v20, %v336_v0  ;;  %v223_v44 = vsel %vm222_vm5, %v217_v3, %v1903_v18  ;;  %v378_v53 = vadd.f32 %v354_v61, %v348_v63  ;;  %v2195_v19 = vpop.permute.xlu0 %504  ;;  %v2262_v20 = vld [vmem:[%s2743_s3 + $0x10] sm:$0xff]  ;;  %v2279_v63 = vld [vmem:[%s2743_s3 + $0x18] sm:$0xff]  ;;  %vm560_vm2 = vmand %vm559_vm12, %vm399_vm7 }
 0x122   :  { %v227_v35 = vsel %vm2148_vm6, %v223_v44, 0.0  ;;  %2831 = vst [vmem:[#allocation37_spill] sm:$0xff] %v2195_v19  ;;  %vm461_vm5 = vcmp.lt.s32.totalorder %v1964_v52, 12  ;;  %v409_v9 = vrot.slane %v2198_v23, %v1976_v24  ;;  %v439_v6 = vrot.slane %v2212_v39, %v1976_v24 }
 0x123   :  { %v304_v29 = vadd.f32 %v298_v59, %v296_v7  ;;  %v233_v2 = vmul.f32 %v1807_v50, %v227_v35  ;;  %v360_v51 = vmul.f32 %v1872_v10, %v227_v35  ;;  %v382_v18 = vadd.f32 %v376_v32, %v374_v58  ;;  %vm462_vm3 = vmand %vm398_vm1, %vm461_vm5  ;;  %v2240_v58 = vld [vmem:[%s2743_s3] sm:$0xff] }
 0x124   :  { %v2193_v5 = vpop.permute.xlu1 %291  ;;  %vm2222_vm11 = vcmp.eq.s32.totalorder %v409_v9, 1  ;;  %v2229_v25 = vsel %vm462_vm3, 1, %v2813_v4  ;;  %vm2231_vm13 = vcmp.eq.s32.totalorder %v439_v6, 1  ;;  %947 = vperm.xlu1 %1541, %v2240_v58   ;;  %v2253_v0 = vsel %vm399_vm7, 1, %v2813_v4 }
 0x125   :  { %2830 = vst [vmem:[#allocation36_spill] sm:$0xff] %v2193_v5  ;;  %v302_v8 = vadd.f32 %v263_v45, %v233_v2  ;;  %v380_v12 = vadd.f32 %v366_v48, %v360_v51  ;;  %v2220_v22 = vpop.permute.xlu0 %572  ;;  %v471_v57 = vrot.slane %v2229_v25, %v1976_v24  ;;  %v501_v3 = vrot.slane %v2253_v0, %v1976_v24 }
 0x126   :  { %2833 = vst [vmem:[#allocation39_spill] sm:$0xff] %v2220_v22  ;;  %v2841_v45 = vmov 1   ;;  %vm2774_vm1 = vcmask 31744   ;;  %v2290_v2 = vsel %vm461_vm5, 1, %v2813_v4  ;;  %vm676_vm3 = vcmp.ge.s32.totalorder %v1959_v47, 8 }
 0x127   :  { %v306_v50 = vadd.f32 %v302_v8, %v300_v1  ;;  %v384_v31 = vadd.f32 %v380_v12, %v378_v53  ;;  %vm2268_vm4 = vcmp.eq.s32.totalorder %v471_v57, 1  ;;  %1543 = vset.pattern.permute.xlu0 %v2841_v45  ;;  %vm503_vm6 = vcmp.eq.s32.totalorder %v501_v3, 1  ;;  %v2848_v3 = vld [vmem:[#allocation28_spill] sm:$0xff] }
 0x128   :  { %v2200_v10 = vpop.permute.xlu1 %414  ;;  %957 = vperm.xlu1 %1541, %v2262_v20   ;;  %1076 = vperm.xlu0 %1543, %v2240_v58   ;;  %v537_v8 = vrot.slane %v2290_v2, %v1976_v24  ;;  %v2842_v12 = vmov 2   ;;  %vm677_vm7 = vcmp.ge.s32.totalorder %v1964_v52, 8  ;;  %v2312_v9 = vsel %vm559_vm12, 1, %v2813_v4 }
 0x129   :  { %2832 = vst [vmem:[#allocation38_spill] sm:$0xff] %v2200_v10  ;;  %v2205_v40 = vadd.f32 %v306_v50, %v304_v29  ;;  %v2207_v21 = vadd.f32 %v384_v31, %v382_v18  ;;  %v2255_v27 = vpop.permute.xlu0 %644  ;;  %v2306_v50 = vsel %vm560_vm2, 1, %v2813_v4  ;;  %v2317_v6 = vsel %vm676_vm3, 1, %v2813_v4  ;;  %vm265_vm2 = vmand %vm203_vm15, %vm99_vm8 }
 0x12a   :  { %2838 = vst [vmem:[#allocation40_spill] sm:$0xff] %v2255_v27  ;;  %v569_v11 = vrot.slane %v2306_v50, %v1976_v24  ;;  %v598_v57 = vrot.slane %v2312_v9, %v1976_v24  ;;  %vm731_vm8 = vcmp.lt.s32.totalorder %v1964_v52, 8  ;;  %vm827_vm15 = vcmp.lt.s32.totalorder %v1959_v47, 8 }
 0x12c   :  { %v417_v62 = vpop.permute.xlu1 %416  ;;  %962 = vperm.xlu1 %1541, %v2279_v63   ;;  %1546 = vset.pattern.permute.xlu0 %v2842_v12 }
 0x12d   :  { %v420_v43 = vsel %vm418_vm10, %v2200_v10, %v417_v62  ;;  %v2283_v48 = vpop.permute.xlu0 %774  ;;  %1104 = vperm.xlu0 %1546, %v942_v13  }
 0x12e   :  { %v424_v55 = vsel %vm2222_vm11, %v420_v43, 0.0  ;;  %vm546_vm11 = vcmask 1014784  }
 0x12f   :  { %v430_v42 = vmul.f32 %v1821_v54, %v424_v55  ;;  %v2856_v55 = vld [vmem:[#allocation15_spill] sm:$0xff]  ;;  %v2862_v54 = vld [vmem:[#allocation10_spill] sm:$0xff] }
 0x130   :  { %v447_v7 = vpop.permute.xlu1 %446  ;;  %1544 = vset.pattern.permute.xlu1 %v2841_v45 }
 0x131   :  { %v450_v41 = vsel %vm448_vm14, %v1948_v37, %v447_v7  ;;  %v2326_v43 = vpop.permute.xlu0 %840  ;;  %1080 = vperm.xlu1 %1544, %v942_v13   ;;  %v2845_v7 = vld [vmem:[#allocation27_spill] sm:$0xff]  ;;  %1108 = vperm.xlu0 %1546, %v2262_v20  }
 0x132   :  { %v454_v28 = vsel %vm2231_vm13, %v450_v41, 0.0  ;;  %vm678_vm13 = vmand %vm676_vm3, %vm677_vm7 }
 0x133   :  { %v460_v15 = vmul.f32 %v1891_v14, %v454_v28  ;;  %v720_v28 = vrot.slane %v2317_v6, %v1976_v24 }
 0x134   :  { %v479_v61 = vpop.permute.xlu1 %478 }
 0x135   :  { %v650_v59 = vadd.f32 %v460_v15, %v430_v42  ;;  %v482_v44 = vsel %vm480_vm9, %v1954_v46, %v479_v61  ;;  %v2339_v15 = vsel %vm678_vm13, 1, %v2813_v4  ;;  %1545 = vset.pattern.permute.xlu1 %v2842_v12  ;;  %vm2355_vm13 = vcmp.eq.s32.totalorder %v598_v57, 1  ;;  %1549 = vset.pattern.permute.xlu0 %v2813_v4  ;;  %v2857_v57 = vld [vmem:[#allocation9_spill] sm:$0xff] }
 0x136   :  { %v486_v35 = vsel %vm2268_vm4, %v482_v44, 0.0  ;;  %vm2328_vm4 = vcmp.eq.s32.totalorder %v537_v8, 1  ;;  %v687_v44 = vrot.slane %v2339_v15, %v1976_v24  ;;  %1100 = vperm.xlu1 %1545, %v2240_v58  }
 0x137   :  { %v492_v1 = vmul.f32 %v1899_v17, %v486_v35  ;;  %v2409_v35 = vsel %vm827_vm15, 1, %v2813_v4  ;;  %v2863_v17 = vld [vmem:[#allocation18_spill] sm:$0xff] }
 0x138   :  { %v509_v29 = vpop.permute.xlu1 %508 }
 0x139   :  { %v512_v51 = vsel %vm2774_vm1, %v1970_v60, %v509_v29  ;;  %vm2362_vm1 = vcmp.eq.s32.totalorder %v720_v28, 1  ;;  %v2366_v29 = vpop.permute.xlu0 %279  ;;  %v2877_v60 = vld [vmem:[#allocation23_spill] sm:$0xff] }
 0x13a   :  { %v516_v18 = vsel %vm503_vm6, %v512_v51, 0.0  ;;  %vm2342_vm6 = vcmp.eq.s32.totalorder %v569_v11, 1  ;;  %2853 = vst [vmem:[#allocation28_spill] sm:$0xff] %v2366_v29  ;;  %v2381_v11 = vld [vmem:[#allocation2 + $0x18] sm:$0xff]  ;;  %1547 = vset.pattern.permute.xlu1 %v2841_v45  ;;  %v2861_v45 = vld [vmem:[#allocation30_spill] sm:$0xff] }
 0x13b   :  { %v522_v53 = vmul.f32 %v1828_v56, %v516_v18  ;;  %1084 = vperm.xlu1 %1547, %v2262_v20  }
 0x13c   :  { %v545_v31 = vpop.permute.xlu1 %544 }
 0x13d   :  { %v652_v62 = vadd.f32 %v522_v53, %v492_v1  ;;  %v548_v41 = vsel %vm546_vm11, %v2845_v7, %v545_v31  ;;  %v2372_v1 = vsel %vm265_vm2, 1, %v2813_v4  ;;  %v2854_v53 = vld [vmem:[#allocation16_spill] sm:$0xff]  ;;  %v2855_v31 = vld [vmem:[#allocation29_spill] sm:$0xff]  ;;  %v278_v27 = vpop.permute.xlu0 %277  ;;  %vm828_vm2 = vmand %vm827_vm15, %vm677_vm7 }
 0x13f   :  { %v658_v49 = vadd.f32 %v652_v62, %v650_v59  ;;  %v552_v59 = vsel %vm2328_vm4, %v548_v41, 0.0  ;;  %v528_v41 = vmul.f32 %v2381_v11, %v2856_v55  ;;  %vm2387_vm4 = vcmp.eq.s32.totalorder %v687_v44, 1  ;;  %1088 = vperm.xlu1 %1547, %v2279_v63  }
 0x140   :  { %v577_v42 = vpop.permute.xlu1 %576  ;;  %v558_v8 = vmul.f32 %v2854_v53, %v552_v59  ;;  %v2392_v59 = vld [vmem:[#allocation2 + $0x10] sm:$0xff] }
 0x141   :  { %v579_v61 = vsel %vm418_vm10, %v2848_v3, %v577_v42  ;;  %v2858_v42 = vld [vmem:[#allocation17_spill] sm:$0xff]  ;;  %v724_v32 = vsel %vm2362_vm1, %v2392_v59, 0.0  ;;  %vm283_vm1 = vcmask 908288  }
 0x142   :  { %v583_v51 = vsel %vm2342_vm6, %v579_v61, 0.0  ;;  %vm732_vm6 = vmand %vm676_vm3, %vm731_vm8  ;;  %v654_v44 = vadd.f32 %v558_v8, %v528_v41  ;;  %v730_v56 = vmul.f32 %v2862_v54, %v724_v32  ;;  %v2421_v41 = vsel %vm677_vm7, 1, %v2813_v4 }
 0x143   :  { %v589_v28 = vmul.f32 %v2857_v57, %v583_v51  ;;  %v2416_v8 = vsel %vm732_vm6, 1, %v2813_v4  ;;  %v771_v32 = vrot.slane %v2421_v41, %v1976_v24  ;;  %1548 = vset.pattern.permute.xlu1 %v2842_v12 }
 0x144   :  { %v606_v18 = vpop.permute.xlu1 %605  ;;  %1112 = vperm.xlu1 %1548, %v2279_v63  }
 0x145   :  { %v608_v58 = vsel %vm448_vm14, %v2855_v31, %v606_v18  ;;  %v270_v18 = vrot.slane %v2372_v1, %v2065_v30 }
 0x146   :  { %v612_v62 = vsel %vm2355_vm13, %v608_v58, 0.0  ;;  %vm2788_vm13 = vcmask 982016  }
 0x147   :  { %v618_v13 = vmul.f32 %v2858_v42, %v612_v62  ;;  %vm275_vm3 = vcmp.eq.s32.totalorder %v270_v18, 1  ;;  %v866_v18 = vrot.slane %v2409_v35, %v1976_v24 }
 0x148   :  { %v698_v58 = vpop.permute.xlu1 %697 }
 0x149   :  { %v656_v51 = vadd.f32 %v618_v13, %v589_v28  ;;  %v701_v62 = vsel %vm2787_vm0, %v2861_v45, %v698_v58  ;;  %v2426_v13 = vsel %vm731_vm8, 1, %v2813_v4  ;;  %vm2453_vm6 = vcmp.eq.s32.totalorder %v866_v18, 1 }
 0x14a   :  { %v705_v14 = vsel %vm2387_vm4, %v701_v62, 0.0  ;;  %vm2446_vm4 = vcmp.eq.s32.totalorder %v771_v32, 1  ;;  %v2872_v32 = vld [vmem:[#allocation31_spill] sm:$0xff] }
 0x14b   :  { %v660_v53 = vadd.f32 %v656_v51, %v654_v44  ;;  %v711_v20 = vmul.f32 %v2863_v17, %v705_v14  ;;  %v284_v14 = vsel %vm283_vm1, %v278_v27, %v2366_v29  ;;  %v741_v44 = vrot.slane %v2416_v8, %v1976_v24 }
 0x14c   :  { %v749_v28 = vpop.permute.xlu1 %748  ;;  %v806_v27 = vrot.slane %v2426_v13, %v1976_v24 }
 0x14d   :  { %v914_v61 = vadd.f32 %v730_v56, %v711_v20  ;;  %v2433_v58 = vadd.f32 %v660_v53, %v658_v49  ;;  %v288_v56 = vsel %vm275_vm3, %v284_v14, 0.0  ;;  %v2867_v53 = vld [vmem:[#allocation32_spill] sm:$0xff]  ;;  %vm2458_vm7 = vcmp.eq.s32.totalorder %v741_v44, 1 }
 0x14e   :  { %v294_v12 = vmul.f32 %v2193_v5, %v288_v56  ;;  %v752_v57 = vsel %vm2788_vm13, %v2872_v32, %v749_v28  ;;  %vm808_vm3 = vcmp.eq.s32.totalorder %v806_v27, 1  ;;  %v870_v44 = vsel %vm2453_vm6, %v2873_v34, 0.0  ;;  %v2874_v27 = vld [vmem:[#allocation20_spill] sm:$0xff]  ;;  %v2878_v34 = vld [vmem:[#allocation11_spill] sm:$0xff] }
 0x14f   :  { %2864 = vst [vmem:[#allocation29_spill] sm:$0xff] %v2433_v58  ;;  %v829_v58 = vsel %vm828_vm2, 1, %v2813_v4  ;;  %v756_v37 = vsel %vm2458_vm7, %v752_v57, 0.0  ;;  %v372_v36 = vmul.f32 %v2874_v27, %v288_v56  ;;  %v797_v14 = vmul.f32 %v2381_v11, %v2878_v34  ;;  %v2879_v57 = vld [vmem:[#allocation12_spill] sm:$0xff] }
 0x150   :  { %v779_v51 = vpop.permute.xlu1 %778  ;;  %v310_v28 = vadd.f32 %v2205_v40, %v294_v12  ;;  %v2880_v12 = vld [vmem:[#allocation26_spill] sm:$0xff] }
 0x151   :  { %v781_v62 = vsel %vm2787_vm0, %v2867_v53, %v779_v51  ;;  %v837_v51 = vrot.slane %v829_v58, %v1976_v24 }
 0x152   :  { %v785_v63 = vsel %vm2446_vm4, %v781_v62, 0.0  ;;  %v2876_v62 = vld [vmem:[#allocation19_spill] sm:$0xff] }
 0x153   :  { %v791_v10 = vmul.f32 %v2875_v33, %v785_v63  ;;  %vm839_vm2 = vcmp.eq.s32.totalorder %v837_v51, 1  ;;  %v762_v19 = vmul.f32 %v2876_v62, %v756_v37  ;;  %v388_v63 = vadd.f32 %v2207_v21, %v372_v36 }
 0x154   :  { %v814_v18 = vpop.permute.xlu1 %813  ;;  %v316_v51 = vadd.f32 %v2141_v38, %v310_v28  ;;  %v716_v36 = vrot.slane %v2317_v6, %v2065_v30  ;;  %v683_v21 = vrot.slane %v2339_v15, %v2065_v30  ;;  %v862_v6 = vrot.slane %v2409_v35, %v2065_v30 }
 0x155   :  { %v816_v42 = vsel %vm2788_vm13, %v2082_v16, %v814_v18  ;;  %v916_v40 = vadd.f32 %v791_v10, %v762_v19  ;;  %v846_v35 = vsel %vm2787_vm0, %v2326_v43, %v2101_v26 }
 0x156   :  { %v820_v55 = vsel %vm808_vm3, %v816_v42, 0.0  ;;  %v876_v42 = vmul.f32 %v2879_v57, %v870_v44  ;;  %v318_v29 = vmax.f32 %v316_v51, 0.0  ;;  %vm721_vm4 = vcmp.eq.s32.totalorder %v716_v36, 1 }
 0x157   :  { %v826_v18 = vmul.f32 %v2877_v60, %v820_v55  ;;  %vm688_vm6 = vcmp.eq.s32.totalorder %v683_v21, 1 }
 0x158   :  { %v845_v49 = vpop.permute.xlu1 %844 }
 0x159   :  { %v847_v20 = vsel %vm2787_vm0, %v2101_v26, %v845_v49  ;;  %v918_v37 = vadd.f32 %v826_v18, %v797_v14  ;;  %v922_v49 = vadd.f32 %v916_v40, %v914_v61  ;;  %v780_v14 = vsel %vm2787_vm0, %v2283_v48, %v2867_v53 }
 0x15a   :  { %v851_v5 = vsel %vm839_vm2, %v847_v20, 0.0 }
 0x15b   :  { %v857_v56 = vmul.f32 %v2880_v12, %v851_v5 }
 0x15c   :  { %v2488_v27 = vpop.permute.xlu1 %391 }
 0x15d   :  { %v920_v55 = vadd.f32 %v876_v42, %v857_v56  ;;  %v394_v7 = vadd.f32 %v2488_v27, %v388_v63 }
 0x15f   :  { %v924_v46 = vadd.f32 %v920_v55, %v918_v37  ;;  %v396_v4 = vmax.f32 %v394_v7, 0.0  ;;  %v767_v7 = vrot.slane %v2421_v41, %v2065_v30  ;;  %v796_v55 = vmul.f32 %v2392_v59, %v2878_v34 }
 0x160   :  { %v2491_v22 = vpop.permute.xlu1 %412  ;;  %v565_v34 = vrot.slane %v2306_v50, %v2065_v30  ;;  %v533_v50 = vrot.slane %v2290_v2, %v2065_v30  ;;  %v2920_v2 = vld [vmem:[#allocation16_spill] sm:$0xff] }
 0x161   :  { %v2493_v44 = vpack.c.bf16 %v396_v4, %v318_v29  ;;  %v2495_v19 = vadd.f32 %v924_v46, %v922_v49  ;;  %v833_v4 = vrot.slane %v829_v58, %v2065_v30  ;;  %v737_v46 = vrot.slane %v2416_v8, %v2065_v30  ;;  %v1554_v29 = vld [vmem:[#allocation2 + $0x8] sm:$0xff] }
 0x162   :  { %v723_v28 = vsel %vm721_vm4, %v1554_v29, 0.0  ;;  %vm2512_vm7 = vcmp.eq.s32.totalorder %v767_v7, 1  ;;  %vm2532_vm4 = vcmp.eq.s32.totalorder %v862_v6, 1  ;;  %v435_v49 = vrot.slane %v2212_v39, %v2065_v30  ;;  %v2558_v7 = vpop.permute.xlu0 %930  ;;  %v2919_v29 = vld [vmem:[#allocation14_spill] sm:$0xff] }
 0x163   :  { %v729_v41 = vmul.f32 %v2862_v54, %v723_v28  ;;  %vm2519_vm3 = vcmp.eq.s32.totalorder %v833_v4, 1  ;;  %vm742_vm2 = vcmp.eq.s32.totalorder %v737_v46, 1  ;;  %v784_v48 = vsel %vm2512_vm7, %v780_v14, 0.0 }
 0x164   :  { %v2497_v5 = vpop.permute.xlu1 %474  ;;  %v850_v26 = vsel %vm2519_vm3, %v846_v35, 0.0  ;;  %v790_v51 = vmul.f32 %v2875_v33, %v784_v48  ;;  %v467_v39 = vrot.slane %v2229_v25, %v2065_v30  ;;  %vm2570_vm7 = vcmp.eq.s32.totalorder %v435_v49, 1 }
 0x165   :  { %v856_v37 = vmul.f32 %v2880_v12, %v850_v26  ;;  %v405_v25 = vrot.slane %v2198_v23, %v2065_v30  ;;  %v2897_v23 = vld [vmem:[#allocation39_spill] sm:$0xff]  ;;  %v2907_v26 = vld [vmem:[#allocation20_spill] sm:$0xff] }
 0x166   :  { %v578_v20 = vsel %vm418_vm10, %v2897_v23, %v2848_v3  ;;  %v2605_v58 = vpop.permute.xlu0 %897 }
 0x168   :  { %v2501_v10 = vpop.permute.xlu1 %540 }
 0x16c   :  { %v602_v61 = vpop.permute.xlu1 %601 }
 0x170   :  { %v694_v18 = vpop.permute.xlu1 %693 }
 0x171   :  { %v700_v15 = vsel %vm2787_vm0, %v694_v18, %v2861_v45  ;;  %v802_v45 = vrot.slane %v2426_v13, %v2065_v30  ;;  %v869_v13 = vsel %vm2532_vm4, %v2381_v11, 0.0  ;;  %vm2590_vm0 = vcmp.eq.s32.totalorder %v467_v39, 1 }
 0x172   :  { %v704_v8 = vsel %vm688_vm6, %v700_v15, 0.0  ;;  %v875_v11 = vmul.f32 %v2879_v57, %v869_v13  ;;  %v607_v18 = vsel %vm448_vm14, %v602_v61, %v2855_v31  ;;  %v2898_v15 = vld [vmem:[#allocation28_spill] sm:$0xff]  ;;  %v2903_v61 = vld [vmem:[#allocation27_spill] sm:$0xff] }
 0x173   :  { %v710_v42 = vmul.f32 %v2863_v17, %v704_v8  ;;  %vm807_vm6 = vcmp.eq.s32.totalorder %v802_v45, 1  ;;  %v2899_v8 = vmov 0   ;;  %v547_v3 = vsel %vm546_vm11, %v2501_v10, %v2903_v61  ;;  %v2911_v10 = vld [vmem:[#allocation38_spill] sm:$0xff]  ;;  %vm880_vm11 = vmand %vm827_vm15, %vm731_vm8 }
 0x174   :  { %v745_v54 = vpop.permute.xlu1 %744  ;;  %v919_v57 = vadd.f32 %v875_v11, %v856_v37  ;;  %v2913_v11 = vld [vmem:[#allocation34_spill] sm:$0xff]  ;;  %v881_v23 = vsel %vm880_vm11, 1, %v2899_v8 }
 0x175   :  { %v913_v56 = vadd.f32 %v729_v41, %v710_v42  ;;  %v751_v63 = vsel %vm2788_vm13, %v745_v54, %v2872_v32  ;;  %v2900_v42 = vld [vmem:[#allocation24_spill] sm:$0xff] }
 0x176   :  { %v755_v43 = vsel %vm742_vm2, %v751_v63, 0.0  ;;  %vm619_vm2 = vmand %vm559_vm12, %vm461_vm5  ;;  %v481_v45 = vsel %vm480_vm9, %v2497_v5, %v2900_v42  ;;  %vm2613_vm5 = vcmp.eq.s32.totalorder %v533_v50, 1  ;;  %vm2620_vm12 = vcmp.eq.s32.totalorder %v405_v25, 1  ;;  %v2906_v63 = vld [vmem:[#allocation36_spill] sm:$0xff]  ;;  %v632_v25 = vpop.permute.xlu0 %631  ;;  %v2924_v42 = vld [vmem:[#allocation7_spill] sm:$0xff] }
 0x177   :  { %v761_v17 = vmul.f32 %v2876_v62, %v755_v43  ;;  %v497_v62 = vrot.slane %v2253_v0, %v2065_v30  ;;  %v594_v0 = vrot.slane %v2312_v9, %v2065_v30  ;;  %v620_v14 = vsel %vm619_vm2, 1, %v2899_v8  ;;  %v2908_v43 = vld [vmem:[#allocation25_spill] sm:$0xff] }
 0x178   :  { %v810_v53 = vpop.permute.xlu1 %809  ;;  %v551_v49 = vsel %vm2613_vm5, %v547_v3, 0.0 }
 0x179   :  { %v815_v32 = vsel %vm2788_vm13, %v810_v53, %v2082_v16  ;;  %v915_v21 = vadd.f32 %v790_v51, %v761_v17  ;;  %v274_v16 = vrot.slane %v2372_v1, %v1976_v24  ;;  %vm2574_vm3 = vcmp.eq.s32.totalorder %v497_v62, 1  ;;  %v2909_v17 = vld [vmem:[#allocation37_spill] sm:$0xff] }
 0x17a   :  { %v819_v36 = vsel %vm807_vm6, %v815_v32, 0.0  ;;  %vm2586_vm6 = vcmp.eq.s32.totalorder %v565_v34, 1  ;;  %vm2594_vm13 = vcmp.eq.s32.totalorder %v594_v0, 1  ;;  %v419_v51 = vsel %vm418_vm10, %v2491_v22, %v2911_v10  ;;  %v2912_v62 = vld [vmem:[#allocation33_spill] sm:$0xff]  ;;  %v2914_v22 = vld [vmem:[#allocation15_spill] sm:$0xff]  ;;  %v2926_v10 = vld [vmem:[#allocation40_spill] sm:$0xff] }
 0x17b   :  { %v825_v33 = vmul.f32 %v2877_v60, %v819_v36  ;;  %v921_v9 = vadd.f32 %v915_v21, %v913_v56  ;;  %vm276_vm4 = vcmp.eq.s32.totalorder %v274_v16, 1  ;;  %v611_v56 = vsel %vm2594_vm13, %v607_v18, 0.0  ;;  %v2915_v16 = vld [vmem:[#allocation22_spill] sm:$0xff]  ;;  %v2916_v34 = vld [vmem:[#allocation35_spill] sm:$0xff]  ;;  %v2917_v0 = vld [vmem:[#allocation17_spill] sm:$0xff] }
 0x17c   :  { %v2568_v12 = vpop.permute.xlu1 %908  ;;  %v582_v53 = vsel %vm2586_vm6, %v578_v20, 0.0  ;;  %v624_v32 = vrot.slane %v620_v14, %v2065_v30  ;;  %v449_v39 = vsel %vm448_vm14, %v2916_v34, %v2915_v16  ;;  %v423_v52 = vsel %vm2620_vm12, %v419_v51, 0.0  ;;  %v939_v20 = vld [vmem:[%s2744_s4 + $0x10] sm:$0xff] }
 0x17d   :  { %v917_v4 = vadd.f32 %v825_v33, %v796_v55  ;;  %v485_v55 = vsel %vm2590_vm0, %v481_v45, 0.0  ;;  %v527_v33 = vmul.f32 %v2392_v59, %v2914_v22  ;;  %v2918_v59 = vld [vmem:[#allocation9_spill] sm:$0xff]  ;;  %v557_v18 = vmul.f32 %v2920_v2, %v551_v49 }
 0x17e   :  { %v491_v28 = vmul.f32 %v2919_v29, %v485_v55  ;;  %v453_v46 = vsel %vm2570_vm7, %v449_v39, 0.0  ;;  %vm2668_vm0 = vcmp.eq.s32.totalorder %v624_v32, 1  ;;  %v429_v45 = vmul.f32 %v2924_v42, %v423_v52 }
 0x17f   :  { %v923_v1 = vadd.f32 %v919_v57, %v917_v4  ;;  %v617_v57 = vmul.f32 %v2917_v0, %v611_v56  ;;  %v628_v4 = vrot.slane %v620_v14, %v1976_v24  ;;  %v889_v60 = vrot.slane %v881_v23, %v1976_v24 }
 0x180   :  { %v282_v6 = vpop.permute.xlu1 %281  ;;  %v885_v24 = vrot.slane %v881_v23, %v2065_v30  ;;  %vm2930_vm13 = vcmask 64512   ;;  %vm965_vm7 = vcmask 261120  }
 0x181   :  { %v285_v41 = vsel %vm283_vm1, %v2898_v15, %v282_v6  ;;  %v2608_v35 = vadd.f32 %v923_v1, %v921_v9  ;;  %vm2910_vm1 = vcmask 31744   ;;  %v588_v1 = vmul.f32 %v2918_v59, %v582_v53  ;;  %v1140_v53 = vpop.permute.xlu0 %1139 }
 0x182   :  { %v289_v54 = vsel %vm276_vm4, %v285_v41, 0.0  ;;  %v511_v13 = vsel %vm2910_vm1, %v2909_v17, %v2908_v43  ;;  %v1211_v41 = vpop.f32.mrb[0].mxu1  ;;  %vm630_vm10 = vcmp.eq.s32.totalorder %v628_v4, 1  ;;  %vm891_vm14 = vcmp.eq.s32.totalorder %v889_v60, 1 }
 0x183   :  { %v295_v48 = vmul.f32 %v2906_v63, %v289_v54  ;;  %v373_v5 = vmul.f32 %v2907_v26, %v289_v54  ;;  %v515_v50 = vsel %vm2574_vm3, %v511_v13, 0.0  ;;  %v655_v31 = vadd.f32 %v617_v57, %v588_v1  ;;  %v1417_v3 = vpop.f32.mrb[1].mxu1  ;;  %v2925_v54 = vld [vmem:[#allocation13_spill] sm:$0xff] }
 0x184   :  { %v2636_v37 = vpop.permute.xlu1 %666  ;;  %v459_v40 = vmul.f32 %v2925_v54, %v453_v46  ;;  %v653_v63 = vadd.f32 %v557_v18, %v527_v33  ;;  %vm890_vm8 = vcmp.eq.s32.totalorder %v885_v24, 1  ;;  %v938_v46 = vld [vmem:[%s2744_s4 + $0x8] sm:$0xff] }
 0x185   :  { %v311_v36 = vadd.f32 %v2912_v62, %v295_v48  ;;  %v389_v21 = vadd.f32 %v2913_v11, %v373_v5  ;;  %v2927_v62 = vld [vmem:[#allocation29_spill] sm:$0xff] }
 0x186   :  { %v649_v43 = vadd.f32 %v459_v40, %v429_v45  ;;  %v659_v17 = vadd.f32 %v655_v31, %v653_v63 }
 0x187   :  { %v317_v47 = vadd.f32 %v2141_v38, %v311_v36  ;;  %v395_v9 = vadd.f32 %v2488_v27, %v389_v21  ;;  %v2923_v27 = vld [vmem:[#allocation8_spill] sm:$0xff]  ;;  %v1212_v21 = vadd.f32 %v1211_v41, %v1140_v53  ;;  %v1555_v41 = vld [vmem:[%s2742_s2] sm:$0xff] }
 0x188   :  { %v634_v6 = vpop.permute.xlu1 %633  ;;  %v521_v14 = vmul.f32 %v2923_v27, %v515_v50 }
 0x189   :  { %v319_v15 = vmax.f32 %v317_v47, 0.0  ;;  %v397_v38 = vmax.f32 %v395_v9, 0.0  ;;  %v637_v61 = vsel %vm480_vm9, %v632_v25, %v634_v6  ;;  %v1215_v57 = vmax.f32 %v1212_v21, 0.0  ;;  %v1221_v9 = vpop.permute.xlu0 %1220 }
 0x18a   :  { %v651_v56 = vadd.f32 %v521_v14, %v491_v28  ;;  %v641_v26 = vsel %vm2668_vm0, %v637_v61, 0.0 }
 0x18b   :  { %v1423_v8 = vpack.c.bf16 %v397_v38, %v319_v15  ;;  %v647_v55 = vmul.f32 %v2926_v10, %v641_v26  ;;  %v940_v15 = vld [vmem:[%s2744_s4 + $0x18] sm:$0xff]  ;;  %v1640_v38 = vmov 43  }
 0x18c   :  { %v636_v48 = vpop.permute.xlu1 %635  ;;  %v657_v32 = vadd.f32 %v651_v56, %v649_v43  ;;  %1550 = vset.pattern.permute.xlu1 %v1640_v38 }
 0x18d   :  { %v638_v5 = vsel %vm480_vm9, %v634_v6, %v636_v48  ;;  %1424 = vmatprep.subr.bf16.mxu0 %v1423_v8  ;;  %vm2928_vm9 = vcmask 982016   ;;  %1378 = vperm.xlu1 %1550, %v1555_v41  }
 0x18e   :  { %v642_v13 = vsel %vm630_vm10, %v638_v5, 0.0  ;;  %1426 = vmatpush1.bf16.msra.mxu0 %v2493_v44  ;;  %v661_v22 = vadd.f32 %v659_v17, %v657_v32  ;;  %vm2929_vm15 = vmmov %vm2928_vm9 }
 0x18f   :  { %v648_v51 = vmul.f32 %v2926_v10, %v642_v13 }
 0x190   :  { %v900_v49 = vpop.permute.xlu1 %899  ;;  %v663_v16 = vadd.f32 %v661_v22, %v647_v55 }
 0x191   :  { %v664_v36 = vadd.f32 %v2927_v62, %v648_v51  ;;  %v902_v11 = vsel %vm2928_vm9, %v2605_v58, %v900_v49 }
 0x192   :  { %v906_v33 = vsel %vm891_vm14, %v902_v11, 0.0  ;;  %v669_v25 = vadd.f32 %v2636_v37, %v663_v16 }
 0x193   :  { %v912_v44 = vmul.f32 %v2568_v12, %v906_v33  ;;  %v670_v0 = vadd.f32 %v2636_v37, %v664_v36 }
 0x194   :  { %v896_v34 = vpop.permute.xlu1 %895  ;;  %v671_v18 = vmax.f32 %v669_v25, 0.0 }
 0x195   :  { %v928_v39 = vadd.f32 %v2495_v19, %v912_v44  ;;  %v901_v30 = vsel %vm2929_vm15, %v896_v34, %v2605_v58  ;;  %v672_v1 = vmax.f32 %v670_v0, 0.0 }
 0x196   :  { %v905_v4 = vsel %vm890_vm8, %v901_v30, 0.0 }
 0x197   :  { %v911_v50 = vmul.f32 %v2568_v12, %v905_v4  ;;  %v934_v52 = vadd.f32 %v2558_v7, %v928_v39  ;;  %v1133_v12 = vld [vmem:[%s2744_s4 + $0x30] sm:$0xff] }
 0x198   :  { %v1217_v47 = vpop.permute.xlu1 %1216 }
 0x199   :  { %v927_v59 = vadd.f32 %v2608_v35, %v911_v50  ;;  %v936_v29 = vmax.f32 %v934_v52, 0.0  ;;  %v1219_v19 = vmul.f32 %v1217_v47, %v1215_v57  ;;  %v937_v35 = vld [vmem:[%s2744_s4] sm:$0xff] }
 0x19b   :  { %v1427_v28 = vpack.c.bf16 %v936_v29, %v672_v1  ;;  %v933_v58 = vadd.f32 %v2558_v7, %v927_v59  ;;  %v1223_v2 = vadd.f32 %v1221_v9, %v1219_v19  ;;  %v2931_v7 = vmov 0.0  }
 0x19d   :  { %1428 = vmatprep.subr.bf16.mxu0 %v1427_v28  ;;  %v935_v6 = vmax.f32 %v933_v58, 0.0  ;;  %v1224_v23 = vmax.f32 %v1223_v2, 0.0 }
 0x19f   :  { %v1429_v37 = vpack.c.bf16 %v935_v6, %v671_v18  ;;  %1419 = vmatpush3.msra.mxu1 %v1224_v23  ;;  %v953_v31 = vpop.permute.xlu0 %952 }
 0x1a0   :  { %1421 = vmatmul.mubr.msk.f32.vlgmr.msra.gmra.mrb[2].mxu1 %vm2930_vm13, %v1133_v12 }
 0x1a1   :  { %1430 = vmatpush1.bf16.msra.mxu0 %v1429_v37  ;;  %1370 = vmatprep.mubr.f32.mxu1 %v2931_v7 }
 0x1a3   :  { %v948_v27 = vpop.permute.xlu1 %947 }
 0x1a4   :  { %1402 = vmatmul.mubr.msk.f32.vlgmr.msra.gmra.mrb[0].mxu0 %vm965_vm7, %v937_v35 }
 0x1a5   :  { %1048 = vmatprep.mubr.f32.mxu0 %v2931_v7 }
 0x1a7   :  { %v958_v14 = vpop.permute.xlu1 %957  ;;  %v1077_v63 = vpop.permute.xlu0 %1076 }
 0x1a8   :  { %1403 = vmatmul.mubr.msk.f32.gmra.mrb[2].mxu0 %vm965_vm7, %v938_v46 }
 0x1a9   :  { %1054 = vmatprep.mubr.f32.mxu0 %v2931_v7 }
 0x1ab   :  { %v963_v42 = vpop.permute.xlu1 %962 }
 0x1ac   :  { %1404 = vmatmul.mubr.msk.f32.gmra.mrb[4].mxu0 %vm965_vm7, %v939_v20  ;;  %v1105_v49 = vpop.permute.xlu0 %1104 }
 0x1ad   :  { %1060 = vmatprep.mubr.f32.mxu0 %v2931_v7 }
 0x1b0   :  { %1405 = vmatmul.mubr.msk.f32.gmra.mrb[6].mxu0 %vm965_vm7, %v940_v15  ;;  %v1081_v45 = vpop.permute.xlu1 %1080  ;;  %v1109_v19 = vpop.permute.xlu0 %1108 }
 0x1b5   :  { %v1101_v60 = vpop.permute.xlu1 %1100 }
 0x1ba   :  { %v1085_v51 = vpop.permute.xlu1 %1084 }
 0x1be   :  { %v1089_v0 = vpop.permute.xlu1 %1088 }
 0x1c3   :  { %v1113_v18 = vpop.permute.xlu1 %1112 }
 0x273   :  { %v1294_v61 = vpop.f32.mrb[2].mxu1 }
 0x274   :  { %1300 = vperm.xlu0 %1549, %v1294_v61   ;;  %v1422_v3 = vpop.f32.mrb[3].mxu1  ;;  %v1379_v61 = vpop.permute.xlu1 %1378 }
 0x277   :  { %v1044_v8 = vpop.f32.mrb[0].mxu0 }
 0x278   :  { %v1045_v54 = vadd.f32 %v1044_v8, %v948_v27  ;;  %v1046_v40 = vpop.f32.mrb[1].mxu0  ;;  %1551 = vset.pattern.permute.xlu0 %v1640_v38 }
 0x279   :  { %v1047_v56 = vadd.f32 %v1046_v40, %v948_v27 }
 0x27a   :  { %v1067_v48 = vmax.f32 %v1045_v54, 0.0 }
 0x27b   :  { %v1068_v26 = vmax.f32 %v1047_v56, 0.0  ;;  %v1050_v5 = vpop.f32.mrb[2].mxu0 }
 0x27c   :  { %v1091_v43 = vmul.f32 %v1077_v63, %v1067_v48  ;;  %v1051_v17 = vadd.f32 %v1050_v5, %v953_v31  ;;  %v1052_v13 = vpop.f32.mrb[3].mxu0 }
 0x27d   :  { %v1092_v53 = vmul.f32 %v1077_v63, %v1068_v26  ;;  %v1053_v10 = vadd.f32 %v1052_v13, %v953_v31 }
 0x27e   :  { %v1069_v24 = vmax.f32 %v1051_v17, 0.0  ;;  %v1115_v62 = vadd.f32 %v1101_v60, %v1091_v43 }
 0x27f   :  { %v1070_v32 = vmax.f32 %v1053_v10, 0.0  ;;  %v1056_v55 = vpop.f32.mrb[4].mxu0  ;;  %v1116_v22 = vadd.f32 %v1101_v60, %v1092_v53 }
 0x280   :  { %v1093_v36 = vmul.f32 %v1081_v45, %v1069_v24  ;;  %v1057_v11 = vadd.f32 %v1056_v55, %v958_v14  ;;  %v1058_v21 = vpop.f32.mrb[5].mxu0  ;;  %v1123_v4 = vmax.f32 %v1115_v62, 0.0 }
 0x281   :  { %v1094_v33 = vmul.f32 %v1081_v45, %v1070_v32  ;;  %v1059_v44 = vadd.f32 %v1058_v21, %v958_v14  ;;  %v1124_v9 = vmax.f32 %v1116_v22, 0.0 }
 0x282   :  { %v1071_v16 = vmax.f32 %v1057_v11, 0.0  ;;  %v1117_v34 = vadd.f32 %v1105_v49, %v1093_v36 }
 0x283   :  { %v1072_v39 = vmax.f32 %v1059_v44, 0.0  ;;  %v1118_v30 = vadd.f32 %v1105_v49, %v1094_v33  ;;  %v1062_v57 = vpop.f32.mrb[6].mxu0 }
 0x284   :  { %v1095_v50 = vmul.f32 %v1085_v51, %v1071_v16  ;;  %v1125_v52 = vmax.f32 %v1117_v34, 0.0  ;;  %v1063_v25 = vadd.f32 %v1062_v57, %v963_v42  ;;  %v1064_v47 = vpop.f32.mrb[7].mxu0 }
 0x285   :  { %v1096_v59 = vmul.f32 %v1085_v51, %v1072_v39  ;;  %v1126_v1 = vmax.f32 %v1118_v30, 0.0  ;;  %v1065_v29 = vadd.f32 %v1064_v47, %v963_v42  ;;  %v1131_v42 = vld [vmem:[%s2744_s4 + $0x20] sm:$0xff] }
 0x286   :  { %v1433_v28 = vpack.c.bf16 %v1125_v52, %v1123_v4  ;;  %v1073_v58 = vmax.f32 %v1063_v25, 0.0  ;;  %v1119_v12 = vadd.f32 %v1109_v19, %v1095_v50 }
 0x287   :  { %v1074_v2 = vmax.f32 %v1065_v29, 0.0  ;;  %v1431_v6 = vpack.c.bf16 %v1126_v1, %v1124_v9  ;;  %v1120_v35 = vadd.f32 %v1109_v19, %v1096_v59 }
 0x288   :  { %v1097_v23 = vmul.f32 %v1089_v0, %v1073_v58  ;;  %v1127_v20 = vmax.f32 %v1119_v12, 0.0 }
 0x289   :  { %v1098_v37 = vmul.f32 %v1089_v0, %v1074_v2  ;;  %1432 = vmatprep.subr.bf16.mxu1 %v1431_v6  ;;  %v1128_v38 = vmax.f32 %v1120_v35, 0.0 }
 0x28a   :  { %v1121_v7 = vadd.f32 %v1113_v18, %v1097_v23  ;;  %1434 = vmatpush1.bf16.msra.mxu1 %v1433_v28 }
 0x28b   :  { %v1122_v46 = vadd.f32 %v1113_v18, %v1098_v37 }
 0x28c   :  { %v1129_v15 = vmax.f32 %v1121_v7, 0.0 }
 0x28d   :  { %v1130_v41 = vmax.f32 %v1122_v46, 0.0 }
 0x28e   :  { %v1437_v27 = vpack.c.bf16 %v1129_v15, %v1127_v20 }
 0x28f   :  { %v1435_v14 = vpack.c.bf16 %v1130_v41, %v1128_v38 }
 0x291   :  { %1436 = vmatprep.subr.bf16.mxu1 %v1435_v14 }
 0x292   :  { %1438 = vmatpush1.bf16.msra.mxu1 %v1437_v27 }
 0x295   :  { %1408 = vmatmul.mubr.msk.f32.vlgmr.msra.gmra.mrb[4].mxu1 %vm965_vm7, %v1131_v42 }
 0x2f3   :  { %v1301_v45 = vpop.permute.xlu0 %1300 }
 0x368   :  { %v1372_v31 = vpop.f32.mrb[4].mxu1 }
 0x369   :  { %v1373_v3 = vadd.f32 %v1372_v31, %v1301_v45  ;;  %v1374_v8 = vpop.f32.mrb[5].mxu1 }
 0x36a   :  { %v1375_v60 = vadd.f32 %v1374_v8, %v1301_v45 }
 0x36b   :  { %v1381_v54 = vadd.f32 %v1379_v61, %v1373_v3 }
 0x36c   :  { %v1382_v40 = vadd.f32 %v1379_v61, %v1375_v60 }
 0x36d   :  { %v1383_v56 = vmax.f32 %v1381_v54, 0.0 }
 0x36e   :  { %v1384_v63 = vmax.f32 %v1382_v40, 0.0 }
 0x36f   :  { %1385 = vst [vmem:[#allocation3] sm:$0xff] %v1383_v56 }
 0x370   :  { %1386 = vst [vmem:[#allocation3 + $0x8] sm:$0xff] %v1384_v63 }
 0x371   :  { %1567 = shalt.err (!%p1564_p4)
}
 0x372   :  { %s1568_s1 = scalar_lea.hbm %s2745_s5, 256 }
 0x373   :  { %p1569_p5 = scmp.ne.s32.totalorder %s2745_s5, %s1568_s1  ;;  %p1572_p6 = scmp.lt.u32.totalorder %s1568_s1, %s2745_s5 }
 0x375   :  { %p1574_p7 = pnand %p1572_p6, %p1569_p5 }
 0x377   :  { %1577 = shalt.err (!%p1574_p7)
}
 0x378   :  { %1396 = dma.vmem_to_hbm [thread:$0]  %s1394_s16, 256, %s2745_s5, [#allocation4]  }
 0x379   :  { %1578 = dma.done.wait [#allocation4], 256  }
 0x37a   :  { %1579 = vsyncadd [#allocation4], 4294967040 }
 0x37b   :  { %1400 = vsyncpa [#allocation4], 1 }

</bundles_post_ra>
